<compile_context>
chip_gen: v7x
topology: tpu7x:2x2x1
jax: 0.10.0
libtpu: 0.0.40
codegen_flags: <defaults>
</compile_context>

<pallas_src>
import functools
import math

import jax
import jax.numpy as jnp
from jax import lax
from jax.experimental import pallas as pl
from jax.experimental.pallas import tpu as pltpu

_HEAD_LANES = 128                          # lane-dense fused head output width
_BBOX_XFORM_CLIP = math.log(1000.0 / 16.0)


def _round_up(x, m):
    return (x + m - 1) // m * m


# -----------------------------------------------------------------------------
# Pallas kernel 1: RPN head (3x3 conv + ReLU, fused 1x1 cls+box heads)
# -----------------------------------------------------------------------------
def _rpn_head_kernel(x_ref, wc_ref, bc_ref, wh_ref, bh_ref, out_ref, acc_ref,
                     *, TH, W8):
    # x_ref:   (1, TH+2, W8, C) bf16 — dx-shifted, H-haloed row tile
    # wc_ref:  (1, 3, C, C)     bf16 — conv taps for this dx (indexed by dy)
    # wh_ref:  (C, 128)         bf16 — fused [cls | box | 0-pad] head weights
    # out_ref: (1, TH*W8, 128)  f32  — lane-dense fused head output
    d = pl.program_id(2)

    @pl.when(d == 0)
    def _init():
        acc_ref[...] = jnp.zeros_like(acc_ref)

    C = x_ref.shape[-1]
    part = None
    for dy in range(3):
        rows = x_ref[0, dy:dy + TH, :, :]            # leading-dim slice (free)
        flat = rows.reshape(TH * W8, C)              # aligned (W8 % 16 == 0)
        p = jnp.dot(flat, wc_ref[0, dy],
                    preferred_element_type=jnp.float32)
        part = p if part is None else part + p
    acc_ref[...] += part

    @pl.when(d == pl.num_programs(2) - 1)
    def _finish():
        hidden = jnp.maximum(acc_ref[...] + bc_ref[...], 0.0)       # f32 ReLU
        out = jnp.dot(hidden.astype(jnp.bfloat16), wh_ref[...],
                      preferred_element_type=jnp.float32) + bh_ref[...]
        out_ref[0] = out                                            # lane-dense


def rpn_head(features_nchw, params, *, tile_h=64):
    """Returns the lane-dense NHWC head slab (N, H, W, 128) in f32.

    Columns [0:A] are objectness logits, [A:5A] are box deltas (anchor-major,
    coordinate-minor), the rest is zero padding.
    """
    N, C, H, W = features_nchw.shape
    P = params["w_heads"].shape[1]

    x = jnp.transpose(features_nchw, (0, 2, 3, 1)).astype(jnp.bfloat16)  # NHWC
    TH = min(tile_h, H)
    H_pad = _round_up(H, TH)
    n_t = H_pad // TH
    W8 = _round_up(W, 16)                       # bf16 sublane packing

    # zero pad: rows -> H_pad plus 1-row halo each side; cols -> 1 left, rest right
    xfull = jnp.pad(x, ((0, 0), (1, H_pad - H + 1), (1, W8 - W + 1), (0, 0)))

    # Materialize (row-tile x dx-shift) windows so the kernel never needs a
    # sublane-misaligned W slice.
    tiles = []
    for t in range(n_t):
        rows = lax.slice_in_dim(xfull, t * TH, t * TH + TH + 2, axis=1)
        for d in range(3):
            tiles.append(lax.slice_in_dim(rows, d, d + W8, axis=2))
    xs = jnp.stack(tiles, axis=1).reshape(N * n_t * 3, TH + 2, W8, C)

    kernel = functools.partial(_rpn_head_kernel, TH=TH, W8=W8)
    slab = pl.pallas_call(
        kernel,
        out_shape=jax.ShapeDtypeStruct((N * n_t, TH * W8, P), jnp.float32),
        grid=(N, n_t, 3),
        in_specs=[
            pl.BlockSpec((1, TH + 2, W8, C),
                         lambda n, t, d: ((n * n_t + t) * 3 + d, 0, 0, 0)),
            pl.BlockSpec((1, 3, C, C), lambda n, t, d: (d, 0, 0, 0)),
            pl.BlockSpec((1, C), lambda n, t, d: (0, 0)),
            pl.BlockSpec((C, P), lambda n, t, d: (0, 0)),
            pl.BlockSpec((1, P), lambda n, t, d: (0, 0)),
        ],
        out_specs=pl.BlockSpec((1, TH * W8, P),
                               lambda n, t, d: (n * n_t + t, 0, 0)),
        scratch_shapes=[pltpu.VMEM((TH * W8, C), jnp.float32)],
        compiler_params=pltpu.CompilerParams(
            dimension_semantics=("parallel", "parallel", "arbitrary"),
            vmem_limit_bytes=48 * 1024 * 1024),
    )(xs, params["w_conv"], params["b_conv"], params["w_heads"],
      params["b_heads"])

    slab = slab.reshape(N, H_pad, W8, P)[:, :H, :W, :]      # valid NHWC slab
    return slab


# -----------------------------------------------------------------------------
# Pallas kernel 2: BoxCoder.decode (weights (1,1,1,1)) + objectness sigmoid
# -----------------------------------------------------------------------------
def _decode_kernel(anc_ref, dlt_ref, lgt_ref, box_ref, sc_ref):
    # anc_ref: (4, TM), dlt_ref: (1, 4, TM), lgt_ref: (1, 1, TM)  — M in lanes
    anc = anc_ref[...]
    dlt = dlt_ref[0]
    sizes = anc[2:4, :] - anc[0:2, :] + 1.0            # [w, h]  (TO_REMOVE = 1)
    ctrs = anc[0:2, :] + 0.5 * sizes                   # [cx, cy]
    pred_ctr = dlt[0:2, :] * sizes + ctrs
    pred_sz = jnp.exp(jnp.minimum(dlt[2:4, :], _BBOX_XFORM_CLIP)) * sizes
    half = 0.5 * pred_sz
    box_ref[0, 0:2, :] = pred_ctr - half               # [x1, y1]
    box_ref[0, 2:4, :] = pred_ctr + half - 1.0         # [x2, y2]
    sc_ref[0] = jax.nn.sigmoid(lgt_ref[0])


def decode_proposals(slab, anchors, num_anchors):
    """slab: NHWC head slab (N,H,W,128); anchors: (M,4). -> (N,M,4), (N,M)."""
    A = num_anchors
    N, H, W, _ = slab.shape
    M = H * W * A
    logits = slab[..., :A].reshape(N, M)               # (h, w, a) ordering
    deltas = slab[..., A:5 * A].reshape(N, M, 4)

    TM = min(2048, _round_up(M, 128))
    M_pad = _round_up(M, TM)

    anchors_t = jnp.pad(anchors.T, ((0, 0), (0, M_pad - M)))          # (4, Mp)
    deltas_t = jnp.pad(jnp.transpose(deltas, (0, 2, 1)),
                       ((0, 0), (0, 0), (0, M_pad - M)))              # (N,4,Mp)
    logits_t = jnp.pad(logits[:, None, :],
                       ((0, 0), (0, 0), (0, M_pad - M)))              # (N,1,Mp)

    boxes_t, scores_t = pl.pallas_call(
        _decode_kernel,
        out_shape=(jax.ShapeDtypeStruct((N, 4, M_pad), jnp.float32),
                   jax.ShapeDtypeStruct((N, 1, M_pad), jnp.float32)),
        grid=(N, M_pad // TM),
        in_specs=[
            pl.BlockSpec((4, TM), lambda n, m: (0, m)),
            pl.BlockSpec((1, 4, TM), lambda n, m: (n, 0, m)),
            pl.BlockSpec((1, 1, TM), lambda n, m: (n, 0, m)),
        ],
        out_specs=(pl.BlockSpec((1, 4, TM), lambda n, m: (n, 0, m)),
                   pl.BlockSpec((1, 1, TM), lambda n, m: (n, 0, m))),
        compiler_params=pltpu.CompilerParams(
            dimension_semantics=("parallel", "parallel")),
    )(anchors_t, deltas_t, logits_t)

    proposals = jnp.transpose(boxes_t, (0, 2, 1))[:, :M, :]
    scores = scores_t[:, 0, :M]
    return proposals, scores


# -----------------------------------------------------------------------------
# Glue: anchor generation (plain JAX index arithmetic)
# -----------------------------------------------------------------------------
def _mkanchors(ws, hs, x_ctr, y_ctr):
    return jnp.stack([x_ctr - 0.5 * (ws - 1.0),
                      y_ctr - 0.5 * (hs - 1.0),
                      x_ctr + 0.5 * (ws - 1.0),
                      y_ctr + 0.5 * (hs - 1.0)], axis=1)


def generate_base_anchors(stride, sizes, aspect_ratios):
    w = float(stride)
    h = float(stride)
    x_ctr = 0.5 * (w - 1.0)
    y_ctr = 0.5 * (h - 1.0)
    size = w * h
    ratios = jnp.asarray(aspect_ratios, jnp.float32)
    ws = jnp.round(jnp.sqrt(size / ratios))
    hs = jnp.round(ws * ratios)
    ratio_anchors = _mkanchors(ws, hs, x_ctr, y_ctr)              # (R, 4)
    all_anchors = []
    for i in range(ratio_anchors.shape[0]):
        a = ratio_anchors[i]
        wi = a[2] - a[0] + 1.0
        hi = a[3] - a[1] + 1.0
        xc = a[0] + 0.5 * (wi - 1.0)
        yc = a[1] + 0.5 * (hi - 1.0)
        scales = jnp.asarray(sizes, jnp.float32) / float(stride)
        all_anchors.append(_mkanchors(wi * scales, hi * scales, xc, yc))
    return jnp.concatenate(all_anchors, axis=0)                   # (A, 4)


def grid_anchors(H, W, stride, base_anchors):
    shift_x = jnp.arange(W, dtype=jnp.float32) * stride
    shift_y = jnp.arange(H, dtype=jnp.float32) * stride
    sx, sy = jnp.meshgrid(shift_x, shift_y)                       # (H, W)
    shifts = jnp.stack([sx.ravel(), sy.ravel(),
                        sx.ravel(), sy.ravel()], axis=1)          # (H*W, 4)
    anchors = shifts[:, None, :] + base_anchors[None, :, :]       # (H*W, A, 4)
    return anchors.reshape(-1, 4)


# -----------------------------------------------------------------------------
# RPNModule forward (single feature level, inference path)
# -----------------------------------------------------------------------------
def rpn_module_forward(features_nchw, params, *, num_anchors, stride=16,
                       anchor_sizes=(32.0,), aspect_ratios=(0.5, 1.0, 2.0)):
    A = num_anchors
    assert A == len(anchor_sizes) * len(aspect_ratios)
    N, C, H, W = features_nchw.shape

    slab = rpn_head(features_nchw, params)                        # (N,H,W,128)

    # PyTorch-parity NCHW head outputs (returned tensors only).
    objectness = jnp.transpose(slab[..., :A], (0, 3, 1, 2))             # (N,A,H,W)
    rpn_box_regression = jnp.transpose(slab[..., A:5 * A], (0, 3, 1, 2))  # (N,4A,H,W)

    base = generate_base_anchors(stride, anchor_sizes, aspect_ratios)
    anchors = grid_anchors(H, W, stride, base)                    # (H*W*A, 4)

    proposals, scores = decode_proposals(slab, anchors, A)
    # TODO(synk): box_selector (top-k / clip / remove_small / NMS) and the
    # loss_evaluator are data-dependent selection ops; not Pallas-translated.
    return proposals, scores, objectness, rpn_box_regression, anchors


# -----------------------------------------------------------------------------
# Parameters (torch OIHW layout -> Pallas layouts, bf16 weights)
# -----------------------------------------------------------------------------
def init_params(key, in_channels, num_anchors):
    C, A = in_channels, num_anchors
    P = _HEAD_LANES
    assert 5 * A <= P
    k1, k2, k3, k4, k5, k6 = jax.random.split(key, 6)
    w_conv = jax.random.normal(k1, (C, C, 3, 3), jnp.float32) * 0.01   # OIHW
    w_cls = jax.random.normal(k2, (A, C, 1, 1), jnp.float32) * 0.01
    w_box = jax.random.normal(k3, (4 * A, C, 1, 1), jnp.float32) * 0.01
    b_conv = jax.random.normal(k4, (C,), jnp.float32) * 0.01
    b_cls = jax.random.normal(k5, (A,), jnp.float32) * 0.01
    b_box = jax.random.normal(k6, (4 * A,), jnp.float32) * 0.01

    w_conv_taps = jnp.transpose(w_conv, (3, 2, 1, 0))      # (dx, dy, Cin, Cout)
    w_cls_t = jnp.transpose(w_cls[:, :, 0, 0], (1, 0))     # (C, A)
    w_box_t = jnp.transpose(w_box[:, :, 0, 0], (1, 0))     # (C, 4A)
    w_heads = jnp.concatenate(
        [w_cls_t, w_box_t, jnp.zeros((C, P - 5 * A), jnp.float32)], axis=1)
    b_heads = jnp.concatenate(
        [b_cls, b_box, jnp.zeros((P - 5 * A,), jnp.float32)])[None, :]

    params = {
        "w_conv": w_conv_taps.astype(jnp.bfloat16),        # (3, 3, C, C)
        "b_conv": b_conv[None, :],                         # (1, C) f32
        "w_heads": w_heads.astype(jnp.bfloat16),           # (C, 128)
        "b_heads": b_heads,                                # (1, 128) f32
    }
    torch_layout = {"w_conv": w_conv, "b_conv": b_conv, "w_cls": w_cls,
                    "b_cls": b_cls, "w_box": w_box, "b_box": b_box}
    return params, torch_layout


# -----------------------------------------------------------------------------
# References (plain JAX / XLA) for correctness checking
# -----------------------------------------------------------------------------
def reference_head(x_nchw, tl):
    dn = ("NCHW", "OIHW", "NCHW")
    xb = x_nchw.astype(jnp.bfloat16)
    y = lax.conv_general_dilated(
        xb, tl["w_conv"].astype(jnp.bfloat16), (1, 1), "SAME",
        dimension_numbers=dn, preferred_element_type=jnp.float32)
    y = jnp.maximum(y + tl["b_conv"].reshape(1, -1, 1, 1), 0.0)
    yb = y.astype(jnp.bfloat16)
    obj = lax.conv_general_dilated(
        yb, tl["w_cls"].astype(jnp.bfloat16), (1, 1), "SAME",
        dimension_numbers=dn, preferred_element_type=jnp.float32
    ) + tl["b_cls"].reshape(1, -1, 1, 1)
    box = lax.conv_general_dilated(
        yb, tl["w_box"].astype(jnp.bfloat16), (1, 1), "SAME",
        dimension_numbers=dn, preferred_element_type=jnp.float32
    ) + tl["b_box"].reshape(1, -1, 1, 1)
    return obj, box


def reference_decode(anchors, deltas, obj):
    widths = anchors[:, 2] - anchors[:, 0] + 1.0
    heights = anchors[:, 3] - anchors[:, 1] + 1.0
    ctr_x = anchors[:, 0] + 0.5 * widths
    ctr_y = anchors[:, 1] + 0.5 * heights
    dx, dy = deltas[..., 0], deltas[..., 1]
    dw = jnp.minimum(deltas[..., 2], _BBOX_XFORM_CLIP)
    dh = jnp.minimum(deltas[..., 3], _BBOX_XFORM_CLIP)
    pcx = dx * widths + ctr_x
    pcy = dy * heights + ctr_y
    pw = jnp.exp(dw) * widths
    ph = jnp.exp(dh) * heights
    boxes = jnp.stack([pcx - 0.5 * pw, pcy - 0.5 * ph,
                       pcx + 0.5 * pw - 1.0, pcy + 0.5 * ph - 1.0], axis=-1)
    return boxes, jax.nn.sigmoid(obj)


if __name__ == "__main__":
    N, C, H, W = 2, 128, 16, 16
    A = 3
    STRIDE = 16
    key = jax.random.PRNGKey(0)
    k_x, k_p = jax.random.split(key)
    features = jax.random.normal(k_x, (N, C, H, W), jnp.float32)
    params, torch_layout = init_params(k_p, C, A)

    fwd = jax.jit(lambda feats, prm: rpn_module_forward(
        feats, prm, num_anchors=A, stride=STRIDE))
    proposals, scores, objectness, box_reg, anchors = jax.block_until_ready(
        fwd(features, params))

    assert proposals.shape == (N, H * W * A, 4)
    assert scores.shape == (N, H * W * A)
    assert objectness.shape == (N, A, H, W)
    assert box_reg.shape == (N, 4 * A, H, W)

    # --- verify head against XLA conv reference (bf16 products, f32 accum) ---
    obj_ref, box_ref = reference_head(features, torch_layout)
    assert jnp.allclose(objectness, obj_ref, atol=5e-3, rtol=2e-2)
    assert jnp.allclose(box_reg, box_ref, atol=5e-3, rtol=2e-2)

    # --- verify decode against plain-JAX reference (same inputs as kernel) ---
    deltas_in = jnp.transpose(box_reg.reshape(N, A, 4, H, W),
                              (0, 3, 4, 1, 2)).reshape(N, -1, 4)
    logits_in = jnp.transpose(objectness, (0, 2, 3, 1)).reshape(N, -1)
    boxes_exp, scores_exp = reference_decode(anchors, deltas_in, logits_in)
    assert jnp.allclose(proposals, boxes_exp, atol=1e-2, rtol=1e-4)
    assert jnp.allclose(scores, scores_exp, atol=1e-4)

    print("KERNEL_OK")
</pallas_src>

<mosaic_0001>
module attributes {stable_mosaic.version = 11 : i64} {
  func.func @_rpn_head_kernel(%arg0: i32, %arg1: i32, %arg2: i32, %arg3: memref<1x18x16x128xbf16, #tpu.memory_space<vmem>>, %arg4: memref<1x3x128x128xbf16, #tpu.memory_space<vmem>>, %arg5: memref<1x128xf32, #tpu.memory_space<vmem>>, %arg6: memref<128x128xbf16, #tpu.memory_space<vmem>>, %arg7: memref<1x128xf32, #tpu.memory_space<vmem>>, %arg8: memref<1x256x128xf32, #tpu.memory_space<vmem>>, %arg9: memref<256x128xf32, #tpu.memory_space<vmem>>) attributes {dimension_semantics = [#tpu.dimension_semantics<parallel>, #tpu.dimension_semantics<parallel>, #tpu.dimension_semantics<arbitrary>], iteration_bounds = array<i64: 2, 1, 3>, scalar_prefetch = 0 : i64, scratch_operands = 1 : i64, tpu.core_type = #tpu.core_type<tc>, window_params = [{transform_indices = @transform_0, window_bounds = array<i64: 1, 18, 16, 128>}, {transform_indices = @transform_1, window_bounds = array<i64: 1, 3, 128, 128>}, {pipeline_mode = #tpu.pipeline_mode<synchronous>, transform_indices = @transform_2, window_bounds = array<i64: 1, 128>}, {pipeline_mode = #tpu.pipeline_mode<synchronous>, transform_indices = @transform_3, window_bounds = array<i64: 128, 128>}, {pipeline_mode = #tpu.pipeline_mode<synchronous>, transform_indices = @transform_4, window_bounds = array<i64: 1, 128>}, {transform_indices = @transform_5, window_bounds = array<i64: 1, 256, 128>}]} {
    %c0_i32 = arith.constant 0 : i32
    %0 = arith.cmpi eq, %arg2, %c0_i32 : i32
    %1 = arith.extui %0 : i1 to i32
    %c0_i32_0 = arith.constant 0 : i32
    %2 = arith.cmpi ne, %1, %c0_i32_0 : i32
    scf.if %2 {
      %cst_29 = arith.constant 0.000000e+00 : f32
      %29 = vector.broadcast %cst_29 : f32 to vector<256x128xf32>
      %c0_30 = arith.constant 0 : index
      %c0_31 = arith.constant 0 : index
      %30 = vector.load %arg9[%c0_30, %c0_31] : memref<256x128xf32, #tpu.memory_space<vmem>>, vector<256x128xf32>
      tpu.vector_store %arg9[%c0_30, %c0_31], %29 {strides = array<i32>} : memref<256x128xf32, #tpu.memory_space<vmem>>, vector<256x128xf32>,
    } else {
    }
    %c0 = arith.constant 0 : index
    %c0_1 = arith.constant 0 : index
    %c0_2 = arith.constant 0 : index
    %c0_3 = arith.constant 0 : index
    %3 = vector.load %arg3[%c0, %c0_1, %c0_2, %c0_3] : memref<1x18x16x128xbf16, #tpu.memory_space<vmem>>, vector<1x16x16x128xbf16>
    %4 = vector.shape_cast %3 : vector<1x16x16x128xbf16> to vector<16x16x128xbf16>
    %5 = vector.shape_cast %4 : vector<16x16x128xbf16> to vector<256x128xbf16>
    %c0_4 = arith.constant 0 : index
    %c0_5 = arith.constant 0 : index
    %c0_6 = arith.constant 0 : index
    %c0_7 = arith.constant 0 : index
    %6 = vector.load %arg4[%c0_4, %c0_5, %c0_6, %c0_7] : memref<1x3x128x128xbf16, #tpu.memory_space<vmem>>, vector<1x1x128x128xbf16>
    %7 = vector.shape_cast %6 : vector<1x1x128x128xbf16> to vector<128x128xbf16>
    %cst = arith.constant dense<0.000000e+00> : vector<256x128xf32>
    %8 = tpu.matmul %5, %7, %cst {dimension_numbers = #tpu.dot_dimension_numbers<[1], [0], [0], [1], [0, 0, 1, 1], [], []>} : vector<256x128xbf16>, vector<128x128xbf16>, vector<256x128xf32> -> vector<256x128xf32>
    %c0_8 = arith.constant 0 : index
    %c1 = arith.constant 1 : index
    %c0_9 = arith.constant 0 : index
    %c0_10 = arith.constant 0 : index
    %9 = vector.load %arg3[%c0_8, %c1, %c0_9, %c0_10] : memref<1x18x16x128xbf16, #tpu.memory_space<vmem>>, vector<1x16x16x128xbf16>
    %10 = vector.shape_cast %9 : vector<1x16x16x128xbf16> to vector<16x16x128xbf16>
    %11 = vector.shape_cast %10 : vector<16x16x128xbf16> to vector<256x128xbf16>
    %c0_11 = arith.constant 0 : index
    %c1_12 = arith.constant 1 : index
    %c0_13 = arith.constant 0 : index
    %c0_14 = arith.constant 0 : index
    %12 = vector.load %arg4[%c0_11, %c1_12, %c0_13, %c0_14] : memref<1x3x128x128xbf16, #tpu.memory_space<vmem>>, vector<1x1x128x128xbf16>
    %13 = vector.shape_cast %12 : vector<1x1x128x128xbf16> to vector<128x128xbf16>
    %cst_15 = arith.constant dense<0.000000e+00> : vector<256x128xf32>
    %14 = tpu.matmul %11, %13, %cst_15 {dimension_numbers = #tpu.dot_dimension_numbers<[1], [0], [0], [1], [0, 0, 1, 1], [], []>} : vector<256x128xbf16>, vector<128x128xbf16>, vector<256x128xf32> -> vector<256x128xf32>
    %15 = arith.addf %8, %14 : vector<256x128xf32>
    %c0_16 = arith.constant 0 : index
    %c2 = arith.constant 2 : index
    %c0_17 = arith.constant 0 : index
    %c0_18 = arith.constant 0 : index
    %16 = vector.load %arg3[%c0_16, %c2, %c0_17, %c0_18] : memref<1x18x16x128xbf16, #tpu.memory_space<vmem>>, vector<1x16x16x128xbf16>
    %17 = vector.shape_cast %16 : vector<1x16x16x128xbf16> to vector<16x16x128xbf16>
    %18 = vector.shape_cast %17 : vector<16x16x128xbf16> to vector<256x128xbf16>
    %c0_19 = arith.constant 0 : index
    %c2_20 = arith.constant 2 : index
    %c0_21 = arith.constant 0 : index
    %c0_22 = arith.constant 0 : index
    %19 = vector.load %arg4[%c0_19, %c2_20, %c0_21, %c0_22] : memref<1x3x128x128xbf16, #tpu.memory_space<vmem>>, vector<1x1x128x128xbf16>
    %20 = vector.shape_cast %19 : vector<1x1x128x128xbf16> to vector<128x128xbf16>
    %cst_23 = arith.constant dense<0.000000e+00> : vector<256x128xf32>
    %21 = tpu.matmul %18, %20, %cst_23 {dimension_numbers = #tpu.dot_dimension_numbers<[1], [0], [0], [1], [0, 0, 1, 1], [], []>} : vector<256x128xbf16>, vector<128x128xbf16>, vector<256x128xf32> -> vector<256x128xf32>
    %22 = arith.addf %15, %21 : vector<256x128xf32>
    %c0_24 = arith.constant 0 : index
    %c0_25 = arith.constant 0 : index
    %23 = vector.load %arg9[%c0_24, %c0_25] : memref<256x128xf32, #tpu.memory_space<vmem>>, vector<256x128xf32>
    %24 = arith.addf %23, %22 : vector<256x128xf32>
    %c0_26 = arith.constant 0 : index
    %c0_27 = arith.constant 0 : index
    %25 = vector.load %arg9[%c0_26, %c0_27] : memref<256x128xf32, #tpu.memory_space<vmem>>, vector<256x128xf32>
    tpu.vector_store %arg9[%c0_26, %c0_27], %24 {strides = array<i32>} : memref<256x128xf32, #tpu.memory_space<vmem>>, vector<256x128xf32>,
    %c2_i32 = arith.constant 2 : i32
    %26 = arith.cmpi eq, %arg2, %c2_i32 : i32
    %27 = arith.extui %26 : i1 to i32
    %c0_i32_28 = arith.constant 0 : i32
    %28 = arith.cmpi ne, %27, %c0_i32_28 : i32
    scf.if %28 {
      %c0_29 = arith.constant 0 : index
      %c0_30 = arith.constant 0 : index
      %29 = vector.load %arg9[%c0_29, %c0_30] : memref<256x128xf32, #tpu.memory_space<vmem>>, vector<256x128xf32>
      %c0_31 = arith.constant 0 : index
      %c0_32 = arith.constant 0 : index
      %30 = vector.load %arg5[%c0_31, %c0_32] : memref<1x128xf32, #tpu.memory_space<vmem>>, vector<1x128xf32>
      %31 = vector.broadcast %30 : vector<1x128xf32> to vector<256x128xf32>
      %32 = arith.addf %29, %31 : vector<256x128xf32>
      %cst_33 = arith.constant 0.000000e+00 : f32
      %33 = vector.broadcast %cst_33 : f32 to vector<256x128xf32>
      %34 = arith.maximumf %32, %33 : vector<256x128xf32>
      %35 = arith.truncf %34 : vector<256x128xf32> to vector<256x128xbf16>
      %c0_34 = arith.constant 0 : index
      %c0_35 = arith.constant 0 : index
      %36 = vector.load %arg6[%c0_34, %c0_35] : memref<128x128xbf16, #tpu.memory_space<vmem>>, vector<128x128xbf16>
      %cst_36 = arith.constant dense<0.000000e+00> : vector<256x128xf32>
      %37 = tpu.matmul %35, %36, %cst_36 {dimension_numbers = #tpu.dot_dimension_numbers<[1], [0], [0], [1], [0, 0, 1, 1], [], []>} : vector<256x128xbf16>, vector<128x128xbf16>, vector<256x128xf32> -> vector<256x128xf32>
      %c0_37 = arith.constant 0 : index
      %c0_38 = arith.constant 0 : index
      %38 = vector.load %arg7[%c0_37, %c0_38] : memref<1x128xf32, #tpu.memory_space<vmem>>, vector<1x128xf32>
      %39 = vector.broadcast %38 : vector<1x128xf32> to vector<256x128xf32>
      %40 = arith.addf %37, %39 : vector<256x128xf32>
      %c0_39 = arith.constant 0 : index
      %c0_40 = arith.constant 0 : index
      %c0_41 = arith.constant 0 : index
      %41 = vector.load %arg8[%c0_39, %c0_40, %c0_41] : memref<1x256x128xf32, #tpu.memory_space<vmem>>, vector<1x256x128xf32>
      %42 = vector.shape_cast %41 : vector<1x256x128xf32> to vector<256x128xf32>
      %43 = vector.shape_cast %40 : vector<256x128xf32> to vector<1x256x128xf32>
      tpu.vector_store %arg8[%c0_39, %c0_40, %c0_41], %43 {strides = array<i32>} : memref<1x256x128xf32, #tpu.memory_space<vmem>>, vector<1x256x128xf32>,
    } else {
    }
    return
  }
  func.func @transform_0(%arg0: i32, %arg1: i32, %arg2: i32) -> (i32, i32, i32, i32) {
    %c1_i32 = arith.constant 1 : i32
    %0 = arith.muli %arg0, %c1_i32 : i32
    %1 = arith.addi %0, %arg1 : i32
    %c3_i32 = arith.constant 3 : i32
    %2 = arith.muli %1, %c3_i32 : i32
    %3 = arith.addi %2, %arg2 : i32
    %c0_i32 = arith.constant 0 : i32
    %c0_i32_0 = arith.constant 0 : i32
    %c0_i32_1 = arith.constant 0 : i32
    %c0_i32_2 = arith.constant 0 : i32
    return %3, %c0_i32, %c0_i32_0, %c0_i32_1 : i32, i32, i32, i32
  }
  func.func @transform_1(%arg0: i32, %arg1: i32, %arg2: i32) -> (i32, i32, i32, i32) {
    %c0_i32 = arith.constant 0 : i32
    %c0_i32_0 = arith.constant 0 : i32
    %c0_i32_1 = arith.constant 0 : i32
    %c0_i32_2 = arith.constant 0 : i32
    return %arg2, %c0_i32, %c0_i32_0, %c0_i32_1 : i32, i32, i32, i32
  }
  func.func @transform_2(%arg0: i32, %arg1: i32, %arg2: i32) -> (i32, i32) {
    %c0_i32 = arith.constant 0 : i32
    %c0_i32_0 = arith.constant 0 : i32
    %c0_i32_1 = arith.constant 0 : i32
    return %c0_i32, %c0_i32_0 : i32, i32
  }
  func.func @transform_3(%arg0: i32, %arg1: i32, %arg2: i32) -> (i32, i32) {
    %c0_i32 = arith.constant 0 : i32
    %c0_i32_0 = arith.constant 0 : i32
    %c0_i32_1 = arith.constant 0 : i32
    return %c0_i32, %c0_i32_0 : i32, i32
  }
  func.func @transform_4(%arg0: i32, %arg1: i32, %arg2: i32) -> (i32, i32) {
    %c0_i32 = arith.constant 0 : i32
    %c0_i32_0 = arith.constant 0 : i32
    %c0_i32_1 = arith.constant 0 : i32
    return %c0_i32, %c0_i32_0 : i32, i32
  }
  func.func @transform_5(%arg0: i32, %arg1: i32, %arg2: i32) -> (i32, i32, i32) {
    %c1_i32 = arith.constant 1 : i32
    %0 = arith.muli %arg0, %c1_i32 : i32
    %1 = arith.addi %0, %arg1 : i32
    %c0_i32 = arith.constant 0 : i32
    %c0_i32_0 = arith.constant 0 : i32
    %c0_i32_1 = arith.constant 0 : i32
    return %1, %c0_i32, %c0_i32_0 : i32, i32, i32
  }
}

module attributes {stable_mosaic.version = 11 : i64} {
  func.func @_decode_kernel(%arg0: i32, %arg1: i32, %arg2: memref<4x768xf32, #tpu.memory_space<vmem>>, %arg3: memref<1x4x768xf32, #tpu.memory_space<vmem>>, %arg4: memref<1x1x768xf32, #tpu.memory_space<vmem>>, %arg5: memref<1x4x768xf32, #tpu.memory_space<vmem>>, %arg6: memref<1x1x768xf32, #tpu.memory_space<vmem>>) attributes {dimension_semantics = [#tpu.dimension_semantics<parallel>, #tpu.dimension_semantics<parallel>], iteration_bounds = array<i64: 2, 1>, scalar_prefetch = 0 : i64, scratch_operands = 0 : i64, tpu.core_type = #tpu.core_type<tc>, window_params = [{transform_indices = @transform_0, window_bounds = array<i64: 4, 768>}, {transform_indices = @transform_1, window_bounds = array<i64: 1, 4, 768>}, {transform_indices = @transform_2, window_bounds = array<i64: 1, 1, 768>}, {transform_indices = @transform_3, window_bounds = array<i64: 1, 4, 768>}, {transform_indices = @transform_4, window_bounds = array<i64: 1, 1, 768>}]} {
    %c0 = arith.constant 0 : index
    %c0_0 = arith.constant 0 : index
    %0 = vector.load %arg2[%c0, %c0_0] : memref<4x768xf32, #tpu.memory_space<vmem>>, vector<4x768xf32>
    %c0_1 = arith.constant 0 : index
    %c0_2 = arith.constant 0 : index
    %c0_3 = arith.constant 0 : index
    %1 = vector.load %arg3[%c0_1, %c0_2, %c0_3] : memref<1x4x768xf32, #tpu.memory_space<vmem>>, vector<1x4x768xf32>
    %2 = vector.shape_cast %1 : vector<1x4x768xf32> to vector<4x768xf32>
    %3 = vector.extract_strided_slice %0 {offsets = [2, 0], sizes = [2, 768], strides = [1, 1]} : vector<4x768xf32> to vector<2x768xf32>
    %4 = vector.extract_strided_slice %0 {offsets = [0, 0], sizes = [2, 768], strides = [1, 1]} : vector<4x768xf32> to vector<2x768xf32>
    %5 = arith.subf %3, %4 : vector<2x768xf32>
    %cst = arith.constant 1.000000e+00 : f32
    %6 = vector.broadcast %cst : f32 to vector<2x768xf32>
    %7 = arith.addf %5, %6 : vector<2x768xf32>
    %8 = vector.extract_strided_slice %0 {offsets = [0, 0], sizes = [2, 768], strides = [1, 1]} : vector<4x768xf32> to vector<2x768xf32>
    %cst_4 = arith.constant 5.000000e-01 : f32
    %9 = vector.broadcast %cst_4 : f32 to vector<2x768xf32>
    %10 = arith.mulf %9, %7 : vector<2x768xf32>
    %11 = arith.addf %8, %10 : vector<2x768xf32>
    %12 = vector.extract_strided_slice %2 {offsets = [0, 0], sizes = [2, 768], strides = [1, 1]} : vector<4x768xf32> to vector<2x768xf32>
    %13 = arith.mulf %12, %7 : vector<2x768xf32>
    %14 = arith.addf %13, %11 : vector<2x768xf32>
    %15 = vector.extract_strided_slice %2 {offsets = [2, 0], sizes = [2, 768], strides = [1, 1]} : vector<4x768xf32> to vector<2x768xf32>
    %cst_5 = arith.constant 4.13516665 : f32
    %16 = vector.broadcast %cst_5 : f32 to vector<2x768xf32>
    %17 = arith.minimumf %15, %16 : vector<2x768xf32>
    %18 = math.exp %17 : vector<2x768xf32>
    %19 = arith.mulf %18, %7 : vector<2x768xf32>
    %cst_6 = arith.constant 5.000000e-01 : f32
    %20 = vector.broadcast %cst_6 : f32 to vector<2x768xf32>
    %21 = arith.mulf %20, %19 : vector<2x768xf32>
    %22 = arith.subf %14, %21 : vector<2x768xf32>
    %c0_7 = arith.constant 0 : index
    %c0_8 = arith.constant 0 : index
    %c0_9 = arith.constant 0 : index
    %23 = vector.load %arg5[%c0_7, %c0_8, %c0_9] : memref<1x4x768xf32, #tpu.memory_space<vmem>>, vector<1x2x768xf32>
    %24 = vector.shape_cast %23 : vector<1x2x768xf32> to vector<2x768xf32>
    %25 = vector.shape_cast %22 : vector<2x768xf32> to vector<1x2x768xf32>
    tpu.vector_store %arg5[%c0_7, %c0_8, %c0_9], %25 {strides = array<i32>} : memref<1x4x768xf32, #tpu.memory_space<vmem>>, vector<1x2x768xf32>,
    %26 = arith.addf %14, %21 : vector<2x768xf32>
    %cst_10 = arith.constant 1.000000e+00 : f32
    %27 = vector.broadcast %cst_10 : f32 to vector<2x768xf32>
    %28 = arith.subf %26, %27 : vector<2x768xf32>
    %c0_11 = arith.constant 0 : index
    %c2 = arith.constant 2 : index
    %c0_12 = arith.constant 0 : index
    %29 = vector.load %arg5[%c0_11, %c2, %c0_12] : memref<1x4x768xf32, #tpu.memory_space<vmem>>, vector<1x2x768xf32>
    %30 = vector.shape_cast %29 : vector<1x2x768xf32> to vector<2x768xf32>
    %31 = vector.shape_cast %28 : vector<2x768xf32> to vector<1x2x768xf32>
    tpu.vector_store %arg5[%c0_11, %c2, %c0_12], %31 {strides = array<i32>} : memref<1x4x768xf32, #tpu.memory_space<vmem>>, vector<1x2x768xf32>,
    %c0_13 = arith.constant 0 : index
    %c0_14 = arith.constant 0 : index
    %c0_15 = arith.constant 0 : index
    %32 = vector.load %arg4[%c0_13, %c0_14, %c0_15] : memref<1x1x768xf32, #tpu.memory_space<vmem>>, vector<1x1x768xf32>
    %33 = vector.shape_cast %32 : vector<1x1x768xf32> to vector<1x768xf32>
    %34 = arith.negf %33 : vector<1x768xf32>
    %35 = math.exp %34 : vector<1x768xf32>
    %cst_16 = arith.constant 1.000000e+00 : f32
    %36 = vector.broadcast %cst_16 : f32 to vector<1x768xf32>
    %37 = arith.addf %36, %35 : vector<1x768xf32>
    %38 = arith.divf %36, %37 : vector<1x768xf32>
    %c0_17 = arith.constant 0 : index
    %c0_18 = arith.constant 0 : index
    %c0_19 = arith.constant 0 : index
    %39 = vector.load %arg6[%c0_17, %c0_18, %c0_19] : memref<1x1x768xf32, #tpu.memory_space<vmem>>, vector<1x1x768xf32>
    %40 = vector.shape_cast %39 : vector<1x1x768xf32> to vector<1x768xf32>
    %41 = vector.shape_cast %38 : vector<1x768xf32> to vector<1x1x768xf32>
    tpu.vector_store %arg6[%c0_17, %c0_18, %c0_19], %41 {strides = array<i32>} : memref<1x1x768xf32, #tpu.memory_space<vmem>>, vector<1x1x768xf32>,
    return
  }
  func.func @transform_0(%arg0: i32, %arg1: i32) -> (i32, i32) {
    %c0_i32 = arith.constant 0 : i32
    %c0_i32_0 = arith.constant 0 : i32
    return %c0_i32, %arg1 : i32, i32
  }
  func.func @transform_1(%arg0: i32, %arg1: i32) -> (i32, i32, i32) {
    %c0_i32 = arith.constant 0 : i32
    %c0_i32_0 = arith.constant 0 : i32
    return %arg0, %c0_i32, %arg1 : i32, i32, i32
  }
  func.func @transform_2(%arg0: i32, %arg1: i32) -> (i32, i32, i32) {
    %c0_i32 = arith.constant 0 : i32
    %c0_i32_0 = arith.constant 0 : i32
    return %arg0, %c0_i32, %arg1 : i32, i32, i32
  }
  func.func @transform_3(%arg0: i32, %arg1: i32) -> (i32, i32, i32) {
    %c0_i32 = arith.constant 0 : i32
    %c0_i32_0 = arith.constant 0 : i32
    return %arg0, %c0_i32, %arg1 : i32, i32, i32
  }
  func.func @transform_4(%arg0: i32, %arg1: i32) -> (i32, i32, i32) {
    %c0_i32 = arith.constant 0 : i32
    %c0_i32_0 = arith.constant 0 : i32
    return %arg0, %c0_i32, %arg1 : i32, i32, i32
  }
}

</mosaic_0001>

<bundles_post_ra>
// kernel: _lambda_.2
= control target key start
LH: loop header
LB: loop body
LE: loop exit
PB: predicated region body
PF: predicated region fallthrough
CT: control target
= control target key end

     0   :  { %s2760_s18 = smov 0   ;;  %s2762_s19 = smov 0   ;;  %s3083_s0 = inlined_call_operand.vmem [shape: bf16[6,18,16,128], index: 0, kind: input, shape index: {}]   ;;  %s3084_s1 = inlined_call_operand.vmem [shape: bf16[3,3,128,128], index: 1, kind: input, shape index: {}]   ;;  %s3085_s2 = inlined_call_operand.vmem [shape: f32[1,128], index: 2, kind: input, shape index: {}]   ;;  %s3086_s3 = inlined_call_operand.vmem [shape: bf16[128,128], index: 3, kind: input, shape index: {}]   ;;  %s3087_s4 = inlined_call_operand.vmem [shape: f32[1,128], index: 4, kind: input, shape index: {}]   ;;  %s3088_s5 = inlined_call_operand.vmem [shape: f32[2,256,128], index: 5, kind: output, shape index: {}]  }
   0x1   :  { %s2764_s20 = smov 0   ;;  %s2766_s21 = smov 0  }
   0x2   :  { %s2768_s22 = smov 0  }
   0x3 LB: > { %s27_s23 = sadd.s32 1, %s2719_s20  ;;  %s34_s24 = sadd.s32 1, %s2723_s21  ;;  %s2727_s22 = sphi %s2768_s22, %s15_s22   ;;  %s2723_s21 = sphi %s2766_s21, %s3092_s21   ;;  %s2719_s20 = sphi %s2764_s20, %s3091_s20   ;;  %s2715_s19 = sphi %s2762_s19, %s3090_s19   ;;  %s2711_s18 = sphi %s2760_s18, %s3089_s18  }
   0x4   : > { %p28_p0 = scmp.ge.s32.totalorder %s27_s23, 3  ;;  %p1994_p1 = scmp.ge.s32.totalorder %s2727_s22, 1 }
   0x5   : > { %p230_p2 = scmp.lt.s32.totalorder %s2727_s22, 7 }
   0x6   : > { %s3094_s23 = smov (%p28_p0, %s27_s23), 0  ;;  %s3096_s24 = smov (!%p28_p0, %s34_s24), %s2723_s21 }
   0x7   : > { %p231_p3 = pnand %p1994_p1, %p230_p2  ;;  %p36_p4 = scmp.ge.s32.totalorder %s3096_s24, 2 }
   0x8   : > { %s268_s25 = smul.u32 (!%p231_p3), 3, %s2715_s19  ;;  %p278_p5 = scmp.lt.s32.totalorder (!%p231_p3), %s2711_s18, 2 }
   0x9   : > { %s3098_s24 = smov (%p36_p4, %s3096_s24), 0  ;;  %234 = sbr.rel (%p231_p3) target bundleno = 625 (0x271), region = 40 }
   0xa   : > { %s269_s26 = sadd.s32 (!%p231_p3), %s2711_s18, %s268_s25  ;;  %p284_p7 = scmp.lt.s32.totalorder (!%p231_p3), %s2715_s19, 1 }
   0xb   : > { %p270_p6 = scmp.lt.s32.totalorder (!%p231_p3), %s269_s26, 5  ;;  %p1999_p8 = scmp.ne.s32.totalorder (!%p231_p3), %s2711_s18, 0 }
  0x10   : > { %s279_s27 = scalar_select %p278_p5, %s2711_s18, 2 }
  0x11   : > { %s3100_s26 = smov (!%p270_p6, %s269_s26), 5  ;;  %s3102_s19 = smov (!%p284_p7, %s2715_s19), 1 }
  0x12   : > { %s2567_s28 = smul.u32 192, %s279_s27  ;;  %s2181_s11 = sshll.u32 %s3102_s19, 8  ;;  %v2729_v0 = vmov (!%p1999_p8), 0.0  }
  0x13   : > { %s2566_s29 = smul.u32 144, %s3100_s26  ;;  %s2808_s14 = scalar_lea.vmem %s3088_s5, %s2181_s11  ;;  %295 = vst [vmem:[#allocation2] sm:$0xff] (!%p1999_p8), %v2729_v0  ;;  %296 = vst [vmem:[#allocation2 + $0x8] sm:$0xff] (!%p1999_p8), %v2729_v0 }
  0x14   : > { %s2798_s7 = scalar_lea.vmem %s3084_s1, %s2567_s28  ;;  %294 = sbr.rel (%p1999_p8) target bundleno = 35 (0x23), region = 44  ;;  %297 = vst [vmem:[#allocation2 + $0x10] sm:$0xff] (!%p1999_p8), %v2729_v0  ;;  %298 = vst [vmem:[#allocation2 + $0x18] sm:$0xff] (!%p1999_p8), %v2729_v0 }
  0x15   : > { %s2803_s10 = scalar_lea.vmem %s3083_s0, %s2566_s29  ;;  %299 = vst [vmem:[#allocation2 + $0x20] sm:$0xff] (!%p1999_p8), %v2729_v0  ;;  %300 = vst [vmem:[#allocation2 + $0x28] sm:$0xff] (!%p1999_p8), %v2729_v0 }
  0x16   : > { %301 = vst [vmem:[#allocation2 + $0x30] sm:$0xff] (!%p1999_p8), %v2729_v0  ;;  %302 = vst [vmem:[#allocation2 + $0x38] sm:$0xff] (!%p1999_p8), %v2729_v0 }
  0x17   : > { %303 = vst [vmem:[#allocation2 + $0x40] sm:$0xff] (!%p1999_p8), %v2729_v0  ;;  %304 = vst [vmem:[#allocation2 + $0x48] sm:$0xff] (!%p1999_p8), %v2729_v0 }
  0x18   : > { %305 = vst [vmem:[#allocation2 + $0x50] sm:$0xff] (!%p1999_p8), %v2729_v0  ;;  %306 = vst [vmem:[#allocation2 + $0x58] sm:$0xff] (!%p1999_p8), %v2729_v0 }
  0x19   : > { %307 = vst [vmem:[#allocation2 + $0x60] sm:$0xff] (!%p1999_p8), %v2729_v0  ;;  %308 = vst [vmem:[#allocation2 + $0x68] sm:$0xff] (!%p1999_p8), %v2729_v0 }
  0x1a   : > { %309 = vst [vmem:[#allocation2 + $0x70] sm:$0xff] (!%p1999_p8), %v2729_v0  ;;  %310 = vst [vmem:[#allocation2 + $0x78] sm:$0xff] (!%p1999_p8), %v2729_v0 }
  0x1b   : > { %311 = vst [vmem:[#allocation2 + $0x80] sm:$0xff] %v2729_v0  ;;  %312 = vst [vmem:[#allocation2 + $0x88] sm:$0xff] %v2729_v0 }
  0x1c   : > { %313 = vst [vmem:[#allocation2 + $0x90] sm:$0xff] %v2729_v0  ;;  %314 = vst [vmem:[#allocation2 + $0x98] sm:$0xff] %v2729_v0 }
  0x1d   : > { %315 = vst [vmem:[#allocation2 + $0xa0] sm:$0xff] %v2729_v0  ;;  %316 = vst [vmem:[#allocation2 + $0xa8] sm:$0xff] %v2729_v0 }
  0x1e   : > { %317 = vst [vmem:[#allocation2 + $0xb0] sm:$0xff] %v2729_v0  ;;  %318 = vst [vmem:[#allocation2 + $0xb8] sm:$0xff] %v2729_v0 }
  0x1f   : > { %319 = vst [vmem:[#allocation2 + $0xc0] sm:$0xff] %v2729_v0  ;;  %320 = vst [vmem:[#allocation2 + $0xc8] sm:$0xff] %v2729_v0 }
  0x20   : > { %321 = vst [vmem:[#allocation2 + $0xd0] sm:$0xff] %v2729_v0  ;;  %322 = vst [vmem:[#allocation2 + $0xd8] sm:$0xff] %v2729_v0 }
  0x21   : > { %323 = vst [vmem:[#allocation2 + $0xe0] sm:$0xff] %v2729_v0  ;;  %324 = vst [vmem:[#allocation2 + $0xe8] sm:$0xff] %v2729_v0 }
  0x22   : > { %325 = vst [vmem:[#allocation2 + $0xf0] sm:$0xff] %v2729_v0  ;;  %326 = vst [vmem:[#allocation2 + $0xf8] sm:$0xff] %v2729_v0 }
  0x23 PF: > { %v2609_v1 = vld [vmem:[%s2798_s7 + $0x40] sm:$0xff]   ;;  %v2611_v3 = vld [vmem:[%s2798_s7 + $0x48] sm:$0xff]   ;;  %v2613_v5 = vld [vmem:[%s2798_s7 + $0x50] sm:$0xff]   ;;  %p2168_p9 = scmp.ne.s32.totalorder %s2711_s18, 2 }
  0x24   : > { %v2610_v2 = vld [vmem:[%s2798_s7] sm:$0xff]   ;;  %2278 = vmatprep.subr.bf16.mxu1 %v2609_v1  ;;  %v2815_v4 = vld [vmem:[%s2798_s7 + $0x8] sm:$0xff]   ;;  %v2820_v6 = vld [vmem:[%s2798_s7 + $0x10] sm:$0xff]  }
  0x25   : > { %2326 = vmatprep.subr.bf16.mxu0 %v2610_v2  ;;  %2279 = vmatpush3.bf16.msra.mxu1 %v2609_v1  ;;  %v2615_v7 = vld [vmem:[%s2798_s7 + $0x58] sm:$0xff]   ;;  %v2617_v9 = vld [vmem:[%s2798_s7 + $0x60] sm:$0xff]   ;;  %v2619_v11 = vld [vmem:[%s2798_s7 + $0x68] sm:$0xff]  }
  0x26   : > { %2327 = vmatpush3.bf16.msra.mxu0 %v2610_v2  ;;  %2280 = vmatprep.subr.bf16.mxu1 %v2611_v3  ;;  %v2826_v8 = vld [vmem:[%s2798_s7 + $0x18] sm:$0xff]   ;;  %v2832_v10 = vld [vmem:[%s2798_s7 + $0x20] sm:$0xff]   ;;  %v2836_v12 = vld [vmem:[%s2798_s7 + $0x28] sm:$0xff]  }
  0x27   : > { %2328 = vmatprep.subr.bf16.mxu0 %v2815_v4  ;;  %v2625_v13 = vld [vmem:[%s2803_s10 + $0x8] sm:$0xff]   ;;  %v2626_v14 = vld [vmem:[%s2803_s10] sm:$0xff]   ;;  %v2621_v15 = vld [vmem:[%s2798_s7 + $0x70] sm:$0xff]  }
  0x28   : > { %2294 = vmatprep.mubr.bf16.mxu1 %v2625_v13  ;;  %2342 = vmatprep.mubr.bf16.mxu0 %v2626_v14  ;;  %v2846_v16 = vld [vmem:[%s2798_s7 + $0x30] sm:$0xff]   ;;  %v2623_v17 = vld [vmem:[%s2798_s7 + $0x78] sm:$0xff]   ;;  %v2629_v20 = vld [vmem:[%s2798_s7 + $0x80] sm:$0xff]  }
  0x29   : > { %2281 = vmatpush3.bf16.msra.mxu1 %v2611_v3  ;;  %v2852_v18 = vld [vmem:[%s2798_s7 + $0x38] sm:$0xff]   ;;  %v2627_v19 = vld [vmem:[%s2803_s10 + $0x10] sm:$0xff]   ;;  %v2628_v21 = vld [vmem:[%s2803_s10 + $0x8] sm:$0xff]  }
  0x2a   : > { %2329 = vmatpush3.bf16.msra.mxu0 %v2815_v4  ;;  %2282 = vmatprep.subr.bf16.mxu1 %v2613_v5  ;;  %v2630_v22 = vld [vmem:[%s2798_s7 + $0x88] sm:$0xff]   ;;  %v2631_v23 = vld [vmem:[%s2803_s10 + $0x18] sm:$0xff]   ;;  %v2632_v24 = vld [vmem:[%s2803_s10 + $0x10] sm:$0xff]  }
  0x2b   : > { %2330 = vmatprep.subr.bf16.mxu0 %v2820_v6  ;;  %v2633_v25 = vld [vmem:[%s2803_s10 + $0x20] sm:$0xff]   ;;  %v2635_v26 = vld [vmem:[%s2798_s7 + $0x90] sm:$0xff]   ;;  %v2634_v27 = vld [vmem:[%s2803_s10 + $0x18] sm:$0xff]  }
  0x2c   : > { %v2637_v28 = vld [vmem:[%s2803_s10 + $0x28] sm:$0xff]   ;;  %v2638_v29 = vld [vmem:[%s2803_s10 + $0x20] sm:$0xff]   ;;  %v2636_v30 = vld [vmem:[%s2798_s7 + $0x98] sm:$0xff]  }
  0x2d   : > { %2283 = vmatpush3.bf16.msra.mxu1 %v2613_v5  ;;  %v2639_v31 = vld [vmem:[%s2803_s10 + $0x30] sm:$0xff]   ;;  %v2641_v32 = vld [vmem:[%s2798_s7 + $0xa0] sm:$0xff]   ;;  %v2640_v33 = vld [vmem:[%s2803_s10 + $0x28] sm:$0xff]  }
  0x2e   : > { %2331 = vmatpush3.bf16.msra.mxu0 %v2820_v6  ;;  %2284 = vmatprep.subr.bf16.mxu1 %v2615_v7  ;;  %v2643_v34 = vld [vmem:[%s2803_s10 + $0x38] sm:$0xff]   ;;  %v2644_v35 = vld [vmem:[%s2803_s10 + $0x30] sm:$0xff]   ;;  %v2642_v36 = vld [vmem:[%s2798_s7 + $0xa8] sm:$0xff]  }
  0x2f   : > { %2332 = vmatprep.subr.bf16.mxu0 %v2826_v8  ;;  %v2645_v37 = vld [vmem:[%s2803_s10 + $0x40] sm:$0xff]   ;;  %v2647_v38 = vld [vmem:[%s2798_s7 + $0xb0] sm:$0xff]   ;;  %v2646_v39 = vld [vmem:[%s2803_s10 + $0x38] sm:$0xff]  }
  0x30   : > { %v2649_v40 = vld [vmem:[%s2803_s10 + $0x48] sm:$0xff]   ;;  %v2650_v41 = vld [vmem:[%s2803_s10 + $0x10] sm:$0xff]   ;;  %v2648_v42 = vld [vmem:[%s2798_s7 + $0xb8] sm:$0xff]  }
  0x31   : > { %2285 = vmatpush3.bf16.msra.mxu1 %v2615_v7  ;;  %v2651_v43 = vld [vmem:[%s2803_s10 + $0x50] sm:$0xff]   ;;  %v2652_v44 = vld [vmem:[%s2803_s10 + $0x18] sm:$0xff]   ;;  %v2654_v46 = vld [vmem:[%s2803_s10 + $0x20] sm:$0xff]  }
  0x32   : > { %2333 = vmatpush3.bf16.msra.mxu0 %v2826_v8  ;;  %2286 = vmatprep.subr.bf16.mxu1 %v2617_v9  ;;  %v2653_v45 = vld [vmem:[%s2803_s10 + $0x58] sm:$0xff]   ;;  %v2655_v47 = vld [vmem:[%s2803_s10 + $0x60] sm:$0xff]   ;;  %v2656_v48 = vld [vmem:[%s2803_s10 + $0x28] sm:$0xff]  }
  0x33   : > { %2334 = vmatprep.subr.bf16.mxu0 %v2832_v10  ;;  %v2657_v49 = vld [vmem:[%s2803_s10 + $0x68] sm:$0xff]   ;;  %v2658_v50 = vld [vmem:[%s2803_s10 + $0x30] sm:$0xff]   ;;  %v2660_v52 = vld [vmem:[%s2803_s10 + $0x38] sm:$0xff]  }
  0x34   : > { %v2659_v51 = vld [vmem:[%s2803_s10 + $0x70] sm:$0xff]   ;;  %v2661_v53 = vld [vmem:[%s2803_s10 + $0x78] sm:$0xff]   ;;  %v2662_v54 = vld [vmem:[%s2803_s10 + $0x40] sm:$0xff]  }
  0x35   : > { %2287 = vmatpush3.bf16.msra.mxu1 %v2617_v9  ;;  %v2663_v55 = vld [vmem:[%s2803_s10 + $0x80] sm:$0xff]   ;;  %v2664_v56 = vld [vmem:[%s2803_s10 + $0x48] sm:$0xff]   ;;  %v2666_v58 = vld [vmem:[%s2803_s10 + $0x50] sm:$0xff]  }
  0x36   : > { %2335 = vmatpush3.bf16.msra.mxu0 %v2832_v10  ;;  %2288 = vmatprep.subr.bf16.mxu1 %v2619_v11  ;;  %v2665_v57 = vld [vmem:[%s2803_s10 + $0x40] sm:$0xff]   ;;  %v2667_v59 = vld [vmem:[%s2803_s10 + $0x48] sm:$0xff]   ;;  %v2668_v60 = vld [vmem:[%s2803_s10 + $0x58] sm:$0xff]  }
  0x37   : > { %2336 = vmatprep.subr.bf16.mxu0 %v2836_v12  ;;  %v2669_v61 = vld [vmem:[%s2803_s10 + $0x50] sm:$0xff]   ;;  %v2670_v62 = vld [vmem:[%s2803_s10 + $0x60] sm:$0xff]   ;;  %v2671_v63 = vld [vmem:[%s2803_s10 + $0x58] sm:$0xff]  }
  0x38   : > { %v2672_v0 = vld [vmem:[%s2803_s10 + $0x68] sm:$0xff]   ;;  %v2673_v1 = vld [vmem:[%s2803_s10 + $0x60] sm:$0xff]   ;;  %v2677_v5 = vld [vmem:[%s2803_s10 + $0x70] sm:$0xff]  }
  0x39   : > { %2289 = vmatpush3.bf16.msra.mxu1 %v2619_v11  ;;  %v2675_v3 = vld [vmem:[%s2803_s10 + $0x68] sm:$0xff]   ;;  %v2679_v7 = vld [vmem:[%s2803_s10 + $0x78] sm:$0xff]  }
  0x3a   : > { %2337 = vmatpush3.bf16.msra.mxu0 %v2836_v12  ;;  %2290 = vmatprep.subr.bf16.mxu1 %v2621_v15 }
  0x3b   : > { %2338 = vmatprep.subr.bf16.mxu0 %v2846_v16 }
  0x3d   : > { %2291 = vmatpush3.bf16.msra.mxu1 %v2621_v15 }
  0x3e   : > { %2339 = vmatpush3.bf16.msra.mxu0 %v2846_v16  ;;  %2292 = vmatprep.subr.bf16.mxu1 %v2623_v17 }
  0x3f   : > { %2340 = vmatprep.subr.bf16.mxu0 %v2852_v18 }
  0x41   : > { %2293 = vmatpush3.bf16.msra.mxu1 %v2623_v17 }
  0x42   : > { %2341 = vmatpush3.bf16.msra.mxu0 %v2852_v18  ;;  %2470 = vmatprep.subr.bf16.mxu1 %v2610_v2 }
  0x43   : > { %2374 = vmatprep.subr.bf16.mxu0 %v2629_v20 }
  0x44   : > { %2295 = vmatmul.mubr.bf16.vlgmr.msra.gmra.mrb[0].mxu1 %v2627_v19 }
  0x45   : > { %2343 = vmatmul.mubr.bf16.vlgmr.msra.gmra.mrb[0].mxu0 %v2628_v21  ;;  %2478 = vmatpush3.bf16.msra.mxu1 %v2610_v2  ;;  %v2674_v2 = vld [vmem:[%s2803_s10 + $0x70] sm:$0xff]  }
  0x46   : > { %2375 = vmatpush3.bf16.msra.mxu0 %v2629_v20  ;;  %2298 = vmatprep.mubr.bf16.mxu1 %v2631_v23 }
  0x47   : > { %2376 = vmatprep.subr.bf16.mxu0 %v2630_v22  ;;  %2346 = vmatprep.mubr.bf16.mxu0 %v2632_v24 }
  0x48   : > { %2471 = vmatprep.subr.bf16.mxu1 %v2815_v4 }
  0x49   : > { %2479 = vmatpush3.bf16.msra.mxu1 %v2815_v4  ;;  %v2676_v4 = vld [vmem:[%s2803_s10 + $0x78] sm:$0xff]  }
  0x4a   : > { %2377 = vmatpush3.bf16.msra.mxu0 %v2630_v22  ;;  %2472 = vmatprep.subr.bf16.mxu1 %v2820_v6 }
  0x4b   : > { %2378 = vmatprep.subr.bf16.mxu0 %v2635_v26 }
  0x4c   : > { %2299 = vmatmul.mubr.bf16.gmra.mrb[4].mxu1 %v2633_v25 }
  0x4d   : > { %2347 = vmatmul.mubr.bf16.gmra.mrb[4].mxu0 %v2634_v27  ;;  %2302 = vmatprep.mubr.bf16.mxu1 %v2637_v28 }
  0x4e   : > { %2379 = vmatpush3.bf16.msra.mxu0 %v2635_v26  ;;  %2350 = vmatprep.mubr.bf16.mxu0 %v2638_v29  ;;  %v1424_v26 = vld [vmem:[#allocation2 + $0x10] sm:$0xff]  ;;  %v1422_v29 = vld [vmem:[#allocation2] sm:$0xff] }
  0x4f   : > { %2380 = vmatprep.subr.bf16.mxu0 %v2636_v30  ;;  %2480 = vmatpush3.bf16.msra.mxu1 %v2820_v6  ;;  %v2678_v6 = vld [vmem:[%s2803_s10 + $0x80] sm:$0xff]  }
  0x50   : > { %2473 = vmatprep.subr.bf16.mxu1 %v2826_v8 }
  0x52   : > { %2381 = vmatpush3.bf16.msra.mxu0 %v2636_v30 }
  0x53   : > { %2382 = vmatprep.subr.bf16.mxu0 %v2641_v32  ;;  %2481 = vmatpush3.bf16.msra.mxu1 %v2826_v8  ;;  %v2680_v8 = vld [vmem:[%s2803_s10 + $0x88] sm:$0xff]  }
  0x54   : > { %2303 = vmatmul.mubr.bf16.gmra.mrb[8].mxu1 %v2639_v31  ;;  %2474 = vmatprep.subr.bf16.mxu1 %v2832_v10 }
  0x55   : > { %2351 = vmatmul.mubr.bf16.gmra.mrb[8].mxu0 %v2640_v33  ;;  %2306 = vmatprep.mubr.bf16.mxu1 %v2643_v34 }
  0x56   : > { %2383 = vmatpush3.bf16.msra.mxu0 %v2641_v32  ;;  %2354 = vmatprep.mubr.bf16.mxu0 %v2644_v35  ;;  %v1425_v32 = vld [vmem:[#allocation2 + $0x18] sm:$0xff] }
  0x57   : > { %2384 = vmatprep.subr.bf16.mxu0 %v2642_v36  ;;  %2482 = vmatpush3.bf16.msra.mxu1 %v2832_v10 }
  0x58   : > { %2475 = vmatprep.subr.bf16.mxu1 %v2836_v12 }
  0x5a   : > { %2385 = vmatpush3.bf16.msra.mxu0 %v2642_v36  ;;  %v1423_v36 = vld [vmem:[#allocation2 + $0x8] sm:$0xff] }
  0x5b   : > { %2386 = vmatprep.subr.bf16.mxu0 %v2647_v38  ;;  %2483 = vmatpush3.bf16.msra.mxu1 %v2836_v12 }
  0x5c   : > { %2307 = vmatmul.mubr.bf16.gmra.mrb[12].mxu1 %v2645_v37  ;;  %2476 = vmatprep.subr.bf16.mxu1 %v2846_v16 }
  0x5d   : > { %2355 = vmatmul.mubr.bf16.gmra.mrb[12].mxu0 %v2646_v39  ;;  %2310 = vmatprep.mubr.bf16.mxu1 %v2649_v40 }
  0x5e   : > { %2387 = vmatpush3.bf16.msra.mxu0 %v2647_v38  ;;  %2390 = vmatprep.mubr.bf16.mxu0 %v2650_v41 }
  0x5f   : > { %2388 = vmatprep.subr.bf16.mxu0 %v2648_v42  ;;  %2484 = vmatpush3.bf16.msra.mxu1 %v2846_v16 }
  0x60   : > { %2477 = vmatprep.subr.bf16.mxu1 %v2852_v18 }
  0x62   : > { %2389 = vmatpush3.bf16.msra.mxu0 %v2648_v42  ;;  %v1428_v42 = vld [vmem:[#allocation2 + $0x30] sm:$0xff] }
  0x63   : > { %2485 = vmatpush3.bf16.msra.mxu1 %v2852_v18 }
  0x64   : > { %2311 = vmatmul.mubr.bf16.gmra.mrb[16].mxu1 %v2651_v43 }
  0x65   : > { %2391 = vmatmul.mubr.bf16.vlgmr.msra.gmra.mrb[0].mxu0 %v2652_v44  ;;  %2314 = vmatprep.mubr.bf16.mxu1 %v2653_v45  ;;  %v1426_v45 = vld [vmem:[#allocation2 + $0x20] sm:$0xff] }
  0x66   : > { %2394 = vmatprep.mubr.bf16.mxu0 %v2654_v46 }
  0x6c   : > { %2315 = vmatmul.mubr.bf16.gmra.mrb[20].mxu1 %v2655_v47 }
  0x6d   : > { %2395 = vmatmul.mubr.bf16.gmra.mrb[4].mxu0 %v2656_v48  ;;  %2318 = vmatprep.mubr.bf16.mxu1 %v2657_v49  ;;  %v1429_v48 = vld [vmem:[#allocation2 + $0x38] sm:$0xff] }
  0x6e   : > { %2398 = vmatprep.mubr.bf16.mxu0 %v2658_v50 }
  0x74   : > { %2319 = vmatmul.mubr.bf16.gmra.mrb[24].mxu1 %v2659_v51 }
  0x75   : > { %2399 = vmatmul.mubr.bf16.gmra.mrb[8].mxu0 %v2660_v52  ;;  %2322 = vmatprep.mubr.bf16.mxu1 %v2661_v53  ;;  %v1427_v52 = vld [vmem:[#allocation2 + $0x28] sm:$0xff] }
  0x76   : > { %2402 = vmatprep.mubr.bf16.mxu0 %v2662_v54 }
  0x7c   : > { %2323 = vmatmul.mubr.bf16.gmra.mrb[28].mxu1 %v2663_v55 }
  0x7d   : > { %2403 = vmatmul.mubr.bf16.gmra.mrb[12].mxu0 %v2664_v56  ;;  %2358 = vmatprep.mubr.bf16.mxu1 %v2665_v57 }
  0x7e   : > { %2406 = vmatprep.mubr.bf16.mxu0 %v2666_v58  ;;  %v1432_v58 = vld [vmem:[#allocation2 + $0x50] sm:$0xff] }
  0x84   : > { %2359 = vmatmul.mubr.bf16.vlgmr.msra.gmra.mrb[16].mxu1 %v2667_v59 }
  0x85   : > { %2407 = vmatmul.mubr.bf16.gmra.mrb[16].mxu0 %v2668_v60  ;;  %2362 = vmatprep.mubr.bf16.mxu1 %v2669_v61  ;;  %v1430_v61 = vld [vmem:[#allocation2 + $0x40] sm:$0xff] }
  0x86   : > { %2410 = vmatprep.mubr.bf16.mxu0 %v2670_v62 }
  0x8c   : > { %2363 = vmatmul.mubr.bf16.gmra.mrb[20].mxu1 %v2671_v63 }
  0x8d   : > { %2411 = vmatmul.mubr.bf16.gmra.mrb[20].mxu0 %v2672_v0  ;;  %2366 = vmatprep.mubr.bf16.mxu1 %v2673_v1  ;;  %v1433_v0 = vld [vmem:[#allocation2 + $0x58] sm:$0xff] }
  0x8e   : > { %2414 = vmatprep.mubr.bf16.mxu0 %v2674_v2 }
  0x94   : > { %2367 = vmatmul.mubr.bf16.gmra.mrb[24].mxu1 %v2675_v3 }
  0x95   : > { %2415 = vmatmul.mubr.bf16.gmra.mrb[24].mxu0 %v2676_v4  ;;  %2370 = vmatprep.mubr.bf16.mxu1 %v2677_v5  ;;  %v1431_v4 = vld [vmem:[#allocation2 + $0x48] sm:$0xff] }
  0x96   : > { %2418 = vmatprep.mubr.bf16.mxu0 %v2678_v6 }
  0x9c   : > { %2371 = vmatmul.mubr.bf16.gmra.mrb[28].mxu1 %v2679_v7 }
  0x9d   : > { %2419 = vmatmul.mubr.bf16.gmra.mrb[28].mxu0 %v2680_v8 }
 0x117   : > { %v2296_v9 = vpop.f32.mrb[0].mxu1 }
 0x118   : > { %v603_v10 = vpop.f32.mrb[1].mxu1 }
 0x119   : > { %v2297_v11 = vpop.f32.mrb[2].mxu1 }
 0x11a   : > { %v606_v12 = vpop.f32.mrb[3].mxu1 }
 0x11f   : > { %v2300_v13 = vpop.f32.mrb[4].mxu1 }
 0x120   : > { %v619_v14 = vpop.f32.mrb[5].mxu1 }
 0x121   : > { %v2301_v15 = vpop.f32.mrb[6].mxu1 }
 0x122   : > { %v622_v16 = vpop.f32.mrb[7].mxu1 }
 0x127   : > { %v2304_v17 = vpop.f32.mrb[8].mxu1 }
 0x128   : > { %v635_v18 = vpop.f32.mrb[9].mxu1 }
 0x129   : > { %v2305_v19 = vpop.f32.mrb[10].mxu1 }
 0x12a   : > { %v638_v20 = vpop.f32.mrb[11].mxu1 }
 0x12f   : > { %v2925_v21 = vpop.f32.mrb[12].mxu1 }
 0x130   : > { %v2927_v22 = vpop.f32.mrb[13].mxu1 }
 0x131   : > { %v2929_v23 = vpop.f32.mrb[14].mxu1 }
 0x132   : > { %v2931_v24 = vpop.f32.mrb[15].mxu1 }
 0x138   : > { %v2392_v25 = vpop.f32.mrb[0].mxu0 }
 0x139   : > { %v2486_v27 = vadd.f32 %v2392_v25, %v2296_v9  ;;  %v1263_v28 = vpop.f32.mrb[1].mxu0 }
 0x13a   : > { %v2487_v30 = vadd.f32 %v1263_v28, %v603_v10  ;;  %v2393_v31 = vpop.f32.mrb[2].mxu0  ;;  %v1436_v10 = vld [vmem:[#allocation2 + $0x70] sm:$0xff] }
 0x13b   : > { %v1456_v33 = vadd.f32 %v2486_v27, %v1424_v26  ;;  %v2488_v34 = vadd.f32 %v2393_v31, %v2297_v11  ;;  %v1266_v35 = vpop.f32.mrb[3].mxu0 }
 0x13c   : > { %v1454_v37 = vadd.f32 %v2487_v30, %v1422_v29  ;;  %v2489_v38 = vadd.f32 %v1266_v35, %v606_v12  ;;  %v1440_v30 = vld [vmem:[#allocation2 + $0x90] sm:$0xff] }
 0x13d   : > { %1488 = vst [vmem:[#allocation2 + $0x10] sm:$0xff] %v1456_v33  ;;  %v1457_v39 = vadd.f32 %v2488_v34, %v1425_v32  ;;  %v1438_v33 = vld [vmem:[#allocation2 + $0x80] sm:$0xff] }
 0x13e   : > { %1486 = vst [vmem:[#allocation2] sm:$0xff] %v1454_v37  ;;  %v1455_v40 = vadd.f32 %v2489_v38, %v1423_v36  ;;  %v1441_v36 = vld [vmem:[#allocation2 + $0x98] sm:$0xff] }
 0x13f   : > { %1489 = vst [vmem:[#allocation2 + $0x18] sm:$0xff] %v1457_v39 }
 0x140   : > { %1487 = vst [vmem:[#allocation2 + $0x8] sm:$0xff] %v1455_v40  ;;  %v2396_v41 = vpop.f32.mrb[4].mxu0  ;;  %v1439_v40 = vld [vmem:[#allocation2 + $0x88] sm:$0xff] }
 0x141   : > { %v2490_v43 = vadd.f32 %v2396_v41, %v2300_v13  ;;  %v1279_v44 = vpop.f32.mrb[5].mxu0  ;;  %v1434_v13 = vld [vmem:[#allocation2 + $0x60] sm:$0xff] }
 0x142   : > { %v2491_v46 = vadd.f32 %v1279_v44, %v619_v14  ;;  %v2397_v47 = vpop.f32.mrb[6].mxu0 }
 0x143   : > { %v1460_v49 = vadd.f32 %v2490_v43, %v1428_v42  ;;  %v2492_v50 = vadd.f32 %v2397_v47, %v2301_v15  ;;  %v1282_v51 = vpop.f32.mrb[7].mxu0  ;;  %v1444_v47 = vld [vmem:[#allocation2 + $0xb0] sm:$0xff] }
 0x144   : > { %v1458_v53 = vadd.f32 %v2491_v46, %v1426_v45  ;;  %v2493_v54 = vadd.f32 %v1282_v51, %v622_v16  ;;  %v1437_v16 = vld [vmem:[#allocation2 + $0x78] sm:$0xff]  ;;  %v1442_v51 = vld [vmem:[#allocation2 + $0xa0] sm:$0xff] }
 0x145   : > { %1492 = vst [vmem:[#allocation2 + $0x30] sm:$0xff] %v1460_v49  ;;  %v1461_v55 = vadd.f32 %v2492_v50, %v1429_v48 }
 0x146   : > { %1490 = vst [vmem:[#allocation2 + $0x20] sm:$0xff] %v1458_v53  ;;  %v1459_v56 = vadd.f32 %v2493_v54, %v1427_v52 }
 0x147   : > { %1493 = vst [vmem:[#allocation2 + $0x38] sm:$0xff] %v1461_v55  ;;  %v1445_v55 = vld [vmem:[#allocation2 + $0xb8] sm:$0xff] }
 0x148   : > { %1491 = vst [vmem:[#allocation2 + $0x28] sm:$0xff] %v1459_v56  ;;  %v2400_v57 = vpop.f32.mrb[8].mxu0 }
 0x149   : > { %v2494_v59 = vadd.f32 %v2400_v57, %v2304_v17  ;;  %v1295_v60 = vpop.f32.mrb[9].mxu0 }
 0x14a   : > { %v2495_v62 = vadd.f32 %v1295_v60, %v635_v18  ;;  %v2401_v63 = vpop.f32.mrb[10].mxu0  ;;  %v1443_v60 = vld [vmem:[#allocation2 + $0xa8] sm:$0xff] }
 0x14b   : > { %v1464_v1 = vadd.f32 %v2494_v59, %v1432_v58  ;;  %v2496_v2 = vadd.f32 %v2401_v63, %v2305_v19  ;;  %v1298_v3 = vpop.f32.mrb[11].mxu0 }
 0x14c   : > { %v1462_v5 = vadd.f32 %v2495_v62, %v1430_v61  ;;  %v2497_v6 = vadd.f32 %v1298_v3, %v638_v20  ;;  %v1435_v20 = vld [vmem:[#allocation2 + $0x68] sm:$0xff]  ;;  %v1448_v3 = vld [vmem:[#allocation2 + $0xd0] sm:$0xff] }
 0x14d   : > { %1496 = vst [vmem:[#allocation2 + $0x50] sm:$0xff] %v1464_v1  ;;  %v1465_v7 = vadd.f32 %v2496_v2, %v1433_v0 }
 0x14e   : > { %1494 = vst [vmem:[#allocation2 + $0x40] sm:$0xff] %v1462_v5  ;;  %v1463_v8 = vadd.f32 %v2497_v6, %v1431_v4 }
 0x14f   : > { %1497 = vst [vmem:[#allocation2 + $0x58] sm:$0xff] %v1465_v7  ;;  %v1446_v7 = vld [vmem:[#allocation2 + $0xc0] sm:$0xff] }
 0x150   : > { %1495 = vst [vmem:[#allocation2 + $0x48] sm:$0xff] %v1463_v8  ;;  %v2404_v9 = vpop.f32.mrb[12].mxu0 }
 0x151   : > { %v2498_v11 = vadd.f32 %v2404_v9, %v2925_v21  ;;  %v1311_v12 = vpop.f32.mrb[13].mxu0 }
 0x152   : > { %v2499_v14 = vadd.f32 %v1311_v12, %v2927_v22  ;;  %v2405_v15 = vpop.f32.mrb[14].mxu0 }
 0x153   : > { %v1468_v17 = vadd.f32 %v2498_v11, %v1436_v10  ;;  %v2500_v18 = vadd.f32 %v2405_v15, %v2929_v23  ;;  %v1314_v19 = vpop.f32.mrb[15].mxu0  ;;  %v1449_v11 = vld [vmem:[#allocation2 + $0xd8] sm:$0xff] }
 0x154   : > { %v1466_v25 = vadd.f32 %v2499_v14, %v1434_v13  ;;  %v2501_v26 = vadd.f32 %v1314_v19, %v2931_v24 }
 0x155   : > { %1500 = vst [vmem:[#allocation2 + $0x70] sm:$0xff] %v1468_v17  ;;  %v1469_v27 = vadd.f32 %v2500_v18, %v1437_v16  ;;  %v1447_v16 = vld [vmem:[#allocation2 + $0xc8] sm:$0xff] }
 0x156   : > { %1498 = vst [vmem:[#allocation2 + $0x60] sm:$0xff] %v1466_v25  ;;  %v1467_v28 = vadd.f32 %v2501_v26, %v1435_v20 }
 0x157   : > { %1501 = vst [vmem:[#allocation2 + $0x78] sm:$0xff] %v1469_v27  ;;  %v2360_v21 = vpop.f32.mrb[16].mxu1  ;;  %v1452_v27 = vld [vmem:[#allocation2 + $0xf0] sm:$0xff] }
 0x158   : > { %1499 = vst [vmem:[#allocation2 + $0x68] sm:$0xff] %v1467_v28  ;;  %v2408_v29 = vpop.f32.mrb[16].mxu0  ;;  %v972_v22 = vpop.f32.mrb[17].mxu1 }
 0x159   : > { %v2502_v31 = vadd.f32 %v2408_v29, %v2360_v21  ;;  %v1327_v32 = vpop.f32.mrb[17].mxu0  ;;  %v2361_v34 = vpop.f32.mrb[18].mxu1 }
 0x15a   : > { %v2503_v23 = vadd.f32 %v1327_v32, %v972_v22  ;;  %v2409_v35 = vpop.f32.mrb[18].mxu0  ;;  %v975_v37 = vpop.f32.mrb[19].mxu1 }
 0x15b   : > { %v1472_v38 = vadd.f32 %v2502_v31, %v1440_v30  ;;  %v2504_v24 = vadd.f32 %v2409_v35, %v2361_v34  ;;  %v1330_v39 = vpop.f32.mrb[19].mxu0  ;;  %v1450_v30 = vld [vmem:[#allocation2 + $0xe0] sm:$0xff] }
 0x15c   : > { %v1470_v41 = vadd.f32 %v2503_v23, %v1438_v33  ;;  %v2505_v42 = vadd.f32 %v1330_v39, %v975_v37  ;;  %v1453_v33 = vld [vmem:[#allocation2 + $0xf8] sm:$0xff]  ;;  %v1451_v37 = vld [vmem:[#allocation2 + $0xe8] sm:$0xff] }
 0x15d   : > { %1504 = vst [vmem:[#allocation2 + $0x90] sm:$0xff] %v1472_v38  ;;  %v1473_v43 = vadd.f32 %v2504_v24, %v1441_v36 }
 0x15e   : > { %1502 = vst [vmem:[#allocation2 + $0x80] sm:$0xff] %v1470_v41  ;;  %v1471_v44 = vadd.f32 %v2505_v42, %v1439_v40  ;;  %v2681_v41 = vld [vmem:[%s3086_s3] sm:$0xff] (!%p2168_p9)   ;;  %v2682_v42 = vld [vmem:[%s3086_s3 + $0x8] sm:$0xff] (!%p2168_p9)  }
 0x15f   : > { %1505 = vst [vmem:[#allocation2 + $0x98] sm:$0xff] %v1473_v43  ;;  %v2364_v45 = vpop.f32.mrb[20].mxu1  ;;  %2422 = vmatprep.subr.bf16.mxu0 (!%p2168_p9), %v2681_v41  ;;  %2550 = vmatprep.subr.bf16.mxu1 (!%p2168_p9), %v2681_v41  ;;  %v2683_v43 = vld [vmem:[%s3086_s3 + $0x10] sm:$0xff] (!%p2168_p9)  }
 0x160   : > { %1503 = vst [vmem:[#allocation2 + $0x88] sm:$0xff] %v1471_v44  ;;  %v2412_v46 = vpop.f32.mrb[20].mxu0  ;;  %v988_v48 = vpop.f32.mrb[21].mxu1  ;;  %2423 = vmatpush3.bf16.msra.mxu0 (!%p2168_p9), %v2681_v41  ;;  %2558 = vmatpush3.bf16.msra.mxu1 (!%p2168_p9), %v2681_v41  ;;  %v2684_v44 = vld [vmem:[%s3086_s3 + $0x18] sm:$0xff] (!%p2168_p9)  }
 0x161   : > { %v2506_v49 = vadd.f32 %v2412_v46, %v2364_v45  ;;  %v1343_v50 = vpop.f32.mrb[21].mxu0  ;;  %v2365_v52 = vpop.f32.mrb[22].mxu1  ;;  %2424 = vmatprep.subr.bf16.mxu0 (!%p2168_p9), %v2682_v42  ;;  %2551 = vmatprep.subr.bf16.mxu1 (!%p2168_p9), %v2682_v42  ;;  %v1522_v45 = vld [vmem:[#allocation2] sm:$0xff] (!%p2168_p9)  ;;  %v1523_v46 = vld [vmem:[#allocation2 + $0x8] sm:$0xff] (!%p2168_p9) }
 0x162   : > { %v2507_v53 = vadd.f32 %v1343_v50, %v988_v48  ;;  %v2413_v54 = vpop.f32.mrb[22].mxu0  ;;  %v991_v56 = vpop.f32.mrb[23].mxu1 }
 0x163   : > { %v1476_v57 = vadd.f32 %v2506_v49, %v1444_v47  ;;  %v2508_v58 = vadd.f32 %v2413_v54, %v2365_v52  ;;  %v1346_v59 = vpop.f32.mrb[23].mxu0  ;;  %v2953_v47 = vld [vmem:[%s3085_s2] ss:$0 sm:$0xff] (!%p2168_p9) }
 0x164   : > { %v1474_v61 = vadd.f32 %v2507_v53, %v1442_v51  ;;  %v2509_v62 = vadd.f32 %v1346_v59, %v991_v56  ;;  %2425 = vmatpush3.bf16.msra.mxu0 (!%p2168_p9), %v2682_v42  ;;  %2559 = vmatpush3.bf16.msra.mxu1 (!%p2168_p9), %v2682_v42  ;;  %v1561_v48 = vadd.f32 (!%p2168_p9), %v2953_v47, %v1522_v45  ;;  %v2685_v56 = vld [vmem:[%s3086_s3 + $0x20] sm:$0xff] (!%p2168_p9)  }
 0x165   : > { %1508 = vst [vmem:[#allocation2 + $0xb0] sm:$0xff] %v1476_v57  ;;  %v1477_v63 = vadd.f32 %v2508_v58, %v1445_v55  ;;  %2426 = vmatprep.subr.bf16.mxu0 (!%p2168_p9), %v2683_v43  ;;  %2552 = vmatprep.subr.bf16.mxu1 (!%p2168_p9), %v2683_v43  ;;  %v1562_v49 = vadd.f32 (!%p2168_p9), %v2953_v47, %v1523_v46  ;;  %v1538_v50 = vld [vmem:[#allocation2 + $0x80] sm:$0xff] (!%p2168_p9)  ;;  %v1532_v46 = vld [vmem:[#allocation2 + $0x50] sm:$0xff] (!%p2168_p9) }
 0x166   : > { %1506 = vst [vmem:[#allocation2 + $0xa0] sm:$0xff] %v1474_v61  ;;  %v1475_v0 = vadd.f32 %v2509_v62, %v1443_v60  ;;  %v1577_v52 = vadd.f32 (!%p2168_p9), %v2953_v47, %v1538_v50  ;;  %v1593_v54 = vmax.f32 (!%p2168_p9), %v1561_v48, 0.0  ;;  %v2686_v61 = vld [vmem:[%s3086_s3 + $0x28] sm:$0xff] (!%p2168_p9)   ;;  %v1524_v62 = vld [vmem:[#allocation2 + $0x10] sm:$0xff] (!%p2168_p9)  ;;  %v1533_v48 = vld [vmem:[#allocation2 + $0x58] sm:$0xff] (!%p2168_p9) }
 0x167   : > { %1509 = vst [vmem:[#allocation2 + $0xb8] sm:$0xff] %v1477_v63  ;;  %v2368_v1 = vpop.f32.mrb[24].mxu1  ;;  %v1539_v51 = vld [vmem:[#allocation2 + $0x88] sm:$0xff] (!%p2168_p9)  ;;  %v1594_v55 = vmax.f32 (!%p2168_p9), %v1562_v49, 0.0  ;;  %v1525_v63 = vld [vmem:[#allocation2 + $0x18] sm:$0xff] (!%p2168_p9) }
 0x168   : > { %1507 = vst [vmem:[#allocation2 + $0xa8] sm:$0xff] %v1475_v0  ;;  %v2416_v2 = vpop.f32.mrb[24].mxu0  ;;  %v1004_v4 = vpop.f32.mrb[25].mxu1  ;;  %v1578_v53 = vadd.f32 (!%p2168_p9), %v2953_v47, %v1539_v51  ;;  %2427 = vmatpush3.bf16.msra.mxu0 (!%p2168_p9), %v2683_v43  ;;  %2560 = vmatpush3.bf16.msra.mxu1 (!%p2168_p9), %v2683_v43  ;;  %v1609_v57 = vmax.f32 (!%p2168_p9), %v1577_v52, 0.0  ;;  %v1540_v0 = vld [vmem:[#allocation2 + $0x90] sm:$0xff] (!%p2168_p9) }
 0x169   : > { %v2510_v5 = vadd.f32 %v2416_v2, %v2368_v1  ;;  %v1359_v6 = vpop.f32.mrb[25].mxu0  ;;  %v2369_v8 = vpop.f32.mrb[26].mxu1  ;;  %2428 = vmatprep.subr.bf16.mxu0 (!%p2168_p9), %v2684_v44  ;;  %2553 = vmatprep.subr.bf16.mxu1 (!%p2168_p9), %v2684_v44  ;;  %v1625_v59 = vpack.c.bf16 (!%p2168_p9), %v1594_v55, %v1593_v54  ;;  %v1541_v1 = vld [vmem:[#allocation2 + $0x98] sm:$0xff] (!%p2168_p9)  ;;  %v1526_v2 = vld [vmem:[#allocation2 + $0x20] sm:$0xff] (!%p2168_p9) }
 0x16a   : > { %v2511_v9 = vadd.f32 %v1359_v6, %v1004_v4  ;;  %v2417_v10 = vpop.f32.mrb[26].mxu0  ;;  %v1007_v12 = vpop.f32.mrb[27].mxu1  ;;  %v1610_v58 = vmax.f32 (!%p2168_p9), %v1578_v53, 0.0  ;;  %v2687_v4 = vld [vmem:[%s3086_s3 + $0x30] sm:$0xff] (!%p2168_p9)   ;;  %v1564_v6 = vadd.f32 (!%p2168_p9), %v2953_v47, %v1525_v63 }
 0x16b   : > { %v1480_v13 = vadd.f32 %v2510_v5, %v1448_v3  ;;  %v2512_v14 = vadd.f32 %v2417_v10, %v2369_v8  ;;  %v1362_v15 = vpop.f32.mrb[27].mxu0  ;;  %2438 = vmatprep.mubr.bf16.mxu0 (!%p2168_p9), %v1625_v59  ;;  %v1527_v3 = vld [vmem:[#allocation2 + $0x28] sm:$0xff] (!%p2168_p9)  ;;  %v1563_v5 = vadd.f32 (!%p2168_p9), %v2953_v47, %v1524_v62  ;;  %v1580_v10 = vadd.f32 (!%p2168_p9), %v2953_v47, %v1541_v1 }
 0x16c   : > { %v1478_v17 = vadd.f32 %v2511_v9, %v1446_v7  ;;  %v2513_v18 = vadd.f32 %v1362_v15, %v1007_v12  ;;  %v1633_v60 = vpack.c.bf16 (!%p2168_p9), %v1610_v58, %v1609_v57  ;;  %2429 = vmatpush3.bf16.msra.mxu0 (!%p2168_p9), %v2684_v44  ;;  %2561 = vmatpush3.bf16.msra.mxu1 (!%p2168_p9), %v2684_v44  ;;  %v2688_v15 = vld [vmem:[%s3086_s3 + $0x38] sm:$0xff] (!%p2168_p9)   ;;  %v1534_v57 = vld [vmem:[#allocation2 + $0x60] sm:$0xff] (!%p2168_p9)  ;;  %v1535_v58 = vld [vmem:[#allocation2 + $0x68] sm:$0xff] (!%p2168_p9) }
 0x16d   : > { %1512 = vst [vmem:[#allocation2 + $0xd0] sm:$0xff] %v1480_v13  ;;  %v1481_v19 = vadd.f32 %v2512_v14, %v1449_v11  ;;  %2430 = vmatprep.subr.bf16.mxu0 (!%p2168_p9), %v2685_v56  ;;  %2554 = vmatprep.subr.bf16.mxu1 (!%p2168_p9), %v2685_v56  ;;  %v1542_v7 = vld [vmem:[#allocation2 + $0xa0] sm:$0xff] (!%p2168_p9)  ;;  %v1579_v9 = vadd.f32 (!%p2168_p9), %v2953_v47, %v1540_v0 }
 0x16e   : > { %1510 = vst [vmem:[#allocation2 + $0xc0] sm:$0xff] %v1478_v17  ;;  %v1479_v20 = vadd.f32 %v2513_v18, %v1447_v16  ;;  %2454 = vmatprep.mubr.bf16.mxu1 (!%p2168_p9), %v1633_v60  ;;  %v1565_v11 = vadd.f32 (!%p2168_p9), %v2953_v47, %v1526_v2  ;;  %v1566_v12 = vadd.f32 (!%p2168_p9), %v2953_v47, %v1527_v3  ;;  %v1595_v16 = vmax.f32 (!%p2168_p9), %v1563_v5, 0.0 }
 0x16f   : > { %1513 = vst [vmem:[#allocation2 + $0xd8] sm:$0xff] %v1481_v19  ;;  %v2372_v25 = vpop.f32.mrb[28].mxu1  ;;  %v1543_v8 = vld [vmem:[#allocation2 + $0xa8] sm:$0xff] (!%p2168_p9)  ;;  %v1581_v13 = vadd.f32 (!%p2168_p9), %v2953_v47, %v1542_v7  ;;  %v1596_v17 = vmax.f32 (!%p2168_p9), %v1564_v6, 0.0  ;;  %v1611_v18 = vmax.f32 (!%p2168_p9), %v1579_v9, 0.0  ;;  %v1612_v19 = vmax.f32 (!%p2168_p9), %v1580_v10, 0.0 }
 0x170   : > { %1511 = vst [vmem:[#allocation2 + $0xc8] sm:$0xff] %v1479_v20  ;;  %v2420_v26 = vpop.f32.mrb[28].mxu0  ;;  %v1020_v28 = vpop.f32.mrb[29].mxu1  ;;  %2431 = vmatpush3.bf16.msra.mxu0 (!%p2168_p9), %v2685_v56  ;;  %2562 = vmatpush3.bf16.msra.mxu1 (!%p2168_p9), %v2685_v56  ;;  %v1582_v14 = vadd.f32 (!%p2168_p9), %v2953_v47, %v1543_v8  ;;  %v1597_v20 = vmax.f32 (!%p2168_p9), %v1565_v11, 0.0  ;;  %v1572_v62 = vadd.f32 (!%p2168_p9), %v2953_v47, %v1533_v48 }
 0x171   : > { %v2514_v21 = vadd.f32 %v2420_v26, %v2372_v25  ;;  %v1375_v29 = vpop.f32.mrb[29].mxu0  ;;  %v2373_v22 = vpop.f32.mrb[30].mxu1  ;;  %2432 = vmatprep.subr.bf16.mxu0 (!%p2168_p9), %v2686_v61  ;;  %2555 = vmatprep.subr.bf16.mxu1 (!%p2168_p9), %v2686_v61  ;;  %v1598_v25 = vmax.f32 (!%p2168_p9), %v1566_v12, 0.0  ;;  %v1528_v26 = vld [vmem:[#allocation2 + $0x30] sm:$0xff] (!%p2168_p9)  ;;  %v1574_v6 = vadd.f32 (!%p2168_p9), %v2953_v47, %v1535_v58 }
 0x172   : > { %v2515_v31 = vadd.f32 %v1375_v29, %v1020_v28  ;;  %v2421_v32 = vpop.f32.mrb[30].mxu0  ;;  %v1023_v34 = vpop.f32.mrb[31].mxu1  ;;  %1521 = sbr.rel (%p2168_p9) target bundleno = 625 (0x271), region = 48  ;;  %v1544_v28 = vld [vmem:[#allocation2 + $0xb0] sm:$0xff] (!%p2168_p9)  ;;  %v1614_v29 = vmax.f32 (!%p2168_p9), %v1582_v14, 0.0  ;;  %v1604_v10 = vmax.f32 (!%p2168_p9), %v1572_v62, 0.0 }
 0x173   : > { %v1484_v23 = vadd.f32 %v2514_v21, %v1452_v27  ;;  %v2516_v35 = vadd.f32 %v2421_v32, %v2373_v22  ;;  %v1378_v36 = vpop.f32.mrb[31].mxu0  ;;  %v1529_v27 = vld [vmem:[#allocation2 + $0x38] sm:$0xff] (!%p2168_p9)  ;;  %v1613_v21 = vmax.f32 (!%p2168_p9), %v1581_v13, 0.0  ;;  %v1530_v22 = vld [vmem:[#allocation2 + $0x40] sm:$0xff] (!%p2168_p9)  ;;  %v1626_v32 = vpack.c.bf16 (!%p2168_p9), %v1596_v17, %v1595_v16  ;;  %v1536_v13 = vld [vmem:[#allocation2 + $0x70] sm:$0xff] (!%p2168_p9) }
 0x174   : > { %v1482_v38 = vadd.f32 %v2515_v31, %v1450_v30  ;;  %v2517_v24 = vadd.f32 %v1378_v36, %v1023_v34  ;;  %2433 = vmatpush3.bf16.msra.mxu0 (!%p2168_p9), %v2686_v61  ;;  %2563 = vmatpush3.bf16.msra.mxu1 (!%p2168_p9), %v2686_v61  ;;  %v1545_v30 = vld [vmem:[#allocation2 + $0xb8] sm:$0xff] (!%p2168_p9)  ;;  %v1531_v31 = vld [vmem:[#allocation2 + $0x48] sm:$0xff] (!%p2168_p9)  ;;  %v1568_v36 = vadd.f32 (!%p2168_p9), %v2953_v47, %v1529_v27  ;;  %v1548_v53 = vld [vmem:[#allocation2 + $0xd0] sm:$0xff] (!%p2168_p9)  ;;  %v1606_v16 = vmax.f32 (!%p2168_p9), %v1574_v6, 0.0 }
 0x175   : > { %1516 = vst [vmem:[#allocation2 + $0xf0] sm:$0xff] %v1484_v23  ;;  %v1485_v39 = vadd.f32 %v2516_v35, %v1453_v33  ;;  %2434 = vmatprep.subr.bf16.mxu0 (!%p2168_p9), %v2687_v4  ;;  %2556 = vmatprep.subr.bf16.mxu1 (!%p2168_p9), %v2687_v4  ;;  %v1546_v33 = vld [vmem:[#allocation2 + $0xc0] sm:$0xff] (!%p2168_p9)  ;;  %v1634_v23 = vpack.c.bf16 (!%p2168_p9), %v1612_v19, %v1611_v18  ;;  %v1537_v14 = vld [vmem:[#allocation2 + $0x78] sm:$0xff] (!%p2168_p9) }
 0x176   : > { %1514 = vst [vmem:[#allocation2 + $0xe0] sm:$0xff] %v1482_v38  ;;  %v1483_v40 = vadd.f32 %v2517_v24, %v1451_v37  ;;  %v1567_v35 = vadd.f32 (!%p2168_p9), %v2953_v47, %v1528_v26  ;;  %v1583_v37 = vadd.f32 (!%p2168_p9), %v2953_v47, %v1544_v28  ;;  %v1627_v38 = vpack.c.bf16 (!%p2168_p9), %v1598_v25, %v1597_v20  ;;  %v1549_v54 = vld [vmem:[#allocation2 + $0xd8] sm:$0xff] (!%p2168_p9) }
 0x177   : > { %1517 = vst [vmem:[#allocation2 + $0xf8] sm:$0xff] %v1485_v39  ;;  %v1547_v34 = vld [vmem:[#allocation2 + $0xc8] sm:$0xff] (!%p2168_p9)  ;;  %v1584_v24 = vadd.f32 (!%p2168_p9), %v2953_v47, %v1545_v30  ;;  %v1569_v39 = vadd.f32 (!%p2168_p9), %v2953_v47, %v1530_v22  ;;  %v1635_v41 = vpack.c.bf16 (!%p2168_p9), %v1614_v29, %v1613_v21  ;;  %v1585_v42 = vadd.f32 (!%p2168_p9), %v2953_v47, %v1546_v33 }
 0x178   : > { %1515 = vst [vmem:[#allocation2 + $0xe8] sm:$0xff] %v1483_v40  ;;  %2435 = vmatpush3.bf16.msra.mxu0 (!%p2168_p9), %v2687_v4  ;;  %2564 = vmatpush3.bf16.msra.mxu1 (!%p2168_p9), %v2687_v4  ;;  %v1570_v40 = vadd.f32 (!%p2168_p9), %v2953_v47, %v1531_v31  ;;  %v1586_v43 = vadd.f32 (!%p2168_p9), %v2953_v47, %v1547_v34  ;;  %v1599_v44 = vmax.f32 (!%p2168_p9), %v1567_v35, 0.0  ;;  %v1600_v45 = vmax.f32 (!%p2168_p9), %v1568_v36, 0.0 }
 0x179   : > { %2436 = vmatprep.subr.bf16.mxu0 %v2688_v15  ;;  %2557 = vmatprep.subr.bf16.mxu1 %v2688_v15  ;;  %v1615_v49 = vmax.f32 %v1583_v37, 0.0  ;;  %v1616_v50 = vmax.f32 %v1584_v24, 0.0  ;;  %v1601_v51 = vmax.f32 %v1569_v39, 0.0  ;;  %v1617_v55 = vmax.f32 %v1585_v42, 0.0 }
 0x17a   : > { %v1602_v52 = vmax.f32 %v1570_v40, 0.0  ;;  %v1618_v56 = vmax.f32 %v1586_v43, 0.0  ;;  %v1571_v61 = vadd.f32 %v2953_v47, %v1532_v46  ;;  %v1587_v63 = vadd.f32 %v2953_v47, %v1548_v53 }
 0x17b   : > { %v1588_v0 = vadd.f32 %v2953_v47, %v1549_v54  ;;  %v1628_v1 = vpack.c.bf16 %v1600_v45, %v1599_v44  ;;  %v1636_v2 = vpack.c.bf16 %v1616_v50, %v1615_v49  ;;  %v1573_v4 = vadd.f32 %v2953_v47, %v1534_v57 }
 0x17c   : > { %2437 = vmatpush3.bf16.msra.mxu0 %v2688_v15  ;;  %2565 = vmatpush3.bf16.msra.mxu1 %v2688_v15  ;;  %v1629_v3 = vpack.c.bf16 %v1602_v52, %v1601_v51  ;;  %v1637_v5 = vpack.c.bf16 %v1618_v56, %v1617_v55  ;;  %v1603_v9 = vmax.f32 %v1571_v61, 0.0  ;;  %v1619_v11 = vmax.f32 %v1587_v63, 0.0  ;;  %v1552_v19 = vld [vmem:[#allocation2 + $0xf0] sm:$0xff] }
 0x17d   : > { %v1550_v59 = vld [vmem:[#allocation2 + $0xe0] sm:$0xff]  ;;  %v1620_v12 = vmax.f32 %v1588_v0, 0.0  ;;  %v1605_v15 = vmax.f32 %v1573_v4, 0.0  ;;  %v1575_v27 = vadd.f32 %v2953_v47, %v1536_v13  ;;  %v1576_v28 = vadd.f32 %v2953_v47, %v1537_v14 }
 0x17e   : > { %v1589_v7 = vadd.f32 %v2953_v47, %v1550_v59  ;;  %v1553_v20 = vld [vmem:[#allocation2 + $0xf8] sm:$0xff]  ;;  %v1630_v25 = vpack.c.bf16 %v1604_v10, %v1603_v9  ;;  %v1591_v21 = vadd.f32 %v2953_v47, %v1552_v19 }
 0x17f   : > { %2439 = vmatmul.mubr.bf16.vlgmr.msra.gmra.mrb[0].mxu0 %v1626_v32  ;;  %2455 = vmatmul.mubr.bf16.vlgmr.msra.gmra.mrb[0].mxu1 %v1634_v23  ;;  %v1551_v60 = vld [vmem:[#allocation2 + $0xe8] sm:$0xff]  ;;  %v1638_v26 = vpack.c.bf16 %v1620_v12, %v1619_v11  ;;  %v1592_v29 = vadd.f32 %v2953_v47, %v1553_v20  ;;  %v1631_v30 = vpack.c.bf16 %v1606_v16, %v1605_v15  ;;  %v1607_v31 = vmax.f32 %v1575_v27, 0.0 }
 0x180   : > { %2442 = vmatprep.mubr.bf16.mxu0 %v1627_v38  ;;  %2458 = vmatprep.mubr.bf16.mxu1 %v1635_v41  ;;  %v1590_v8 = vadd.f32 %v2953_v47, %v1551_v60  ;;  %v1621_v17 = vmax.f32 %v1589_v7, 0.0  ;;  %v1608_v32 = vmax.f32 %v1576_v28, 0.0  ;;  %v1623_v33 = vmax.f32 %v1591_v21, 0.0  ;;  %v3002_v47 = vld [vmem:[%s3087_s4] ss:$0 sm:$0xff] }
 0x181   : > { %v1624_v34 = vmax.f32 %v1592_v29, 0.0 }
 0x182   : > { %v1622_v18 = vmax.f32 %v1590_v8, 0.0  ;;  %v1632_v23 = vpack.c.bf16 %v1608_v32, %v1607_v31 }
 0x183   : > { %v1640_v35 = vpack.c.bf16 %v1624_v34, %v1623_v33 }
 0x184   : > { %v1639_v22 = vpack.c.bf16 %v1622_v18, %v1621_v17 }
 0x187   : > { %2443 = vmatmul.mubr.bf16.gmra.mrb[4].mxu0 %v1628_v1  ;;  %2459 = vmatmul.mubr.bf16.gmra.mrb[4].mxu1 %v1636_v2 }
 0x188   : > { %2446 = vmatprep.mubr.bf16.mxu0 %v1629_v3  ;;  %2462 = vmatprep.mubr.bf16.mxu1 %v1637_v5 }
 0x18f   : > { %2447 = vmatmul.mubr.bf16.gmra.mrb[8].mxu0 %v1630_v25  ;;  %2463 = vmatmul.mubr.bf16.gmra.mrb[8].mxu1 %v1638_v26 }
 0x190   : > { %2450 = vmatprep.mubr.bf16.mxu0 %v1631_v30  ;;  %2466 = vmatprep.mubr.bf16.mxu1 %v1639_v22 }
 0x197   : > { %2451 = vmatmul.mubr.bf16.gmra.mrb[12].mxu0 %v1632_v23  ;;  %2467 = vmatmul.mubr.bf16.gmra.mrb[12].mxu1 %v1640_v35 }
 0x252   : > { %v2440_v36 = vpop.f32.mrb[0].mxu0  ;;  %v2456_v37 = vpop.f32.mrb[0].mxu1 }
 0x253   : > { %v1755_v38 = vadd.f32 %v2440_v36, %v3002_v47  ;;  %v1819_v24 = vadd.f32 %v2456_v37, %v3002_v47  ;;  %v1746_v39 = vpop.f32.mrb[1].mxu0  ;;  %v1810_v40 = vpop.f32.mrb[1].mxu1 }
 0x254   : > { %v1747_v41 = vadd.f32 %v3002_v47, %v1746_v39  ;;  %v1811_v42 = vadd.f32 %v3002_v47, %v1810_v40  ;;  %v2441_v43 = vpop.f32.mrb[2].mxu0  ;;  %v2457_v44 = vpop.f32.mrb[2].mxu1 }
 0x255   : > { %1875 = vst [vmem:[%s2808_s14 + $0x10] sm:$0xff] %v1755_v38  ;;  %1891 = vst [vmem:[%s2808_s14 + $0x90] sm:$0xff] %v1819_v24  ;;  %v1758_v45 = vadd.f32 %v2441_v43, %v3002_v47  ;;  %v1822_v46 = vadd.f32 %v2457_v44, %v3002_v47  ;;  %v1749_v48 = vpop.f32.mrb[3].mxu0  ;;  %v1813_v49 = vpop.f32.mrb[3].mxu1 }
 0x256   : > { %1873 = vst [vmem:[%s2808_s14] sm:$0xff] %v1747_v41  ;;  %1889 = vst [vmem:[%s2808_s14 + $0x80] sm:$0xff] %v1811_v42  ;;  %v1750_v50 = vadd.f32 %v3002_v47, %v1749_v48  ;;  %v1814_v51 = vadd.f32 %v3002_v47, %v1813_v49 }
 0x257   : > { %1876 = vst [vmem:[%s2808_s14 + $0x18] sm:$0xff] %v1758_v45  ;;  %1892 = vst [vmem:[%s2808_s14 + $0x98] sm:$0xff] %v1822_v46 }
 0x258   : > { %1874 = vst [vmem:[%s2808_s14 + $0x8] sm:$0xff] %v1750_v50  ;;  %1890 = vst [vmem:[%s2808_s14 + $0x88] sm:$0xff] %v1814_v51 }
 0x25a   : > { %v2444_v52 = vpop.f32.mrb[4].mxu0  ;;  %v2460_v53 = vpop.f32.mrb[4].mxu1 }
 0x25b   : > { %v1771_v54 = vadd.f32 %v2444_v52, %v3002_v47  ;;  %v1835_v55 = vadd.f32 %v2460_v53, %v3002_v47  ;;  %v1762_v56 = vpop.f32.mrb[5].mxu0  ;;  %v1826_v57 = vpop.f32.mrb[5].mxu1 }
 0x25c   : > { %v1763_v58 = vadd.f32 %v3002_v47, %v1762_v56  ;;  %v1827_v59 = vadd.f32 %v3002_v47, %v1826_v57  ;;  %v2445_v60 = vpop.f32.mrb[6].mxu0  ;;  %v2461_v61 = vpop.f32.mrb[6].mxu1 }
 0x25d   : > { %1879 = vst [vmem:[%s2808_s14 + $0x30] sm:$0xff] %v1771_v54  ;;  %1895 = vst [vmem:[%s2808_s14 + $0xb0] sm:$0xff] %v1835_v55  ;;  %v1774_v62 = vadd.f32 %v2445_v60, %v3002_v47  ;;  %v1838_v63 = vadd.f32 %v2461_v61, %v3002_v47  ;;  %v1765_v0 = vpop.f32.mrb[7].mxu0  ;;  %v1829_v1 = vpop.f32.mrb[7].mxu1 }
 0x25e   : > { %1877 = vst [vmem:[%s2808_s14 + $0x20] sm:$0xff] %v1763_v58  ;;  %1893 = vst [vmem:[%s2808_s14 + $0xa0] sm:$0xff] %v1827_v59  ;;  %v1766_v2 = vadd.f32 %v3002_v47, %v1765_v0  ;;  %v1830_v3 = vadd.f32 %v3002_v47, %v1829_v1 }
 0x25f   : > { %1880 = vst [vmem:[%s2808_s14 + $0x38] sm:$0xff] %v1774_v62  ;;  %1896 = vst [vmem:[%s2808_s14 + $0xb8] sm:$0xff] %v1838_v63 }
 0x260   : > { %1878 = vst [vmem:[%s2808_s14 + $0x28] sm:$0xff] %v1766_v2  ;;  %1894 = vst [vmem:[%s2808_s14 + $0xa8] sm:$0xff] %v1830_v3 }
 0x262   : > { %v2448_v4 = vpop.f32.mrb[8].mxu0  ;;  %v2464_v5 = vpop.f32.mrb[8].mxu1 }
 0x263   : > { %v1787_v6 = vadd.f32 %v2448_v4, %v3002_v47  ;;  %v1851_v7 = vadd.f32 %v2464_v5, %v3002_v47  ;;  %v1778_v8 = vpop.f32.mrb[9].mxu0  ;;  %v1842_v9 = vpop.f32.mrb[9].mxu1 }
 0x264   : > { %v1779_v10 = vadd.f32 %v3002_v47, %v1778_v8  ;;  %v1843_v11 = vadd.f32 %v3002_v47, %v1842_v9  ;;  %v2449_v12 = vpop.f32.mrb[10].mxu0  ;;  %v2465_v13 = vpop.f32.mrb[10].mxu1 }
 0x265   : > { %1883 = vst [vmem:[%s2808_s14 + $0x50] sm:$0xff] %v1787_v6  ;;  %1899 = vst [vmem:[%s2808_s14 + $0xd0] sm:$0xff] %v1851_v7  ;;  %v1790_v14 = vadd.f32 %v2449_v12, %v3002_v47  ;;  %v1854_v15 = vadd.f32 %v2465_v13, %v3002_v47  ;;  %v1781_v16 = vpop.f32.mrb[11].mxu0  ;;  %v1845_v17 = vpop.f32.mrb[11].mxu1 }
 0x266   : > { %1881 = vst [vmem:[%s2808_s14 + $0x40] sm:$0xff] %v1779_v10  ;;  %1897 = vst [vmem:[%s2808_s14 + $0xc0] sm:$0xff] %v1843_v11  ;;  %v1782_v18 = vadd.f32 %v3002_v47, %v1781_v16  ;;  %v1846_v19 = vadd.f32 %v3002_v47, %v1845_v17 }
 0x267   : > { %1884 = vst [vmem:[%s2808_s14 + $0x58] sm:$0xff] %v1790_v14  ;;  %1900 = vst [vmem:[%s2808_s14 + $0xd8] sm:$0xff] %v1854_v15 }
 0x268   : > { %1882 = vst [vmem:[%s2808_s14 + $0x48] sm:$0xff] %v1782_v18  ;;  %1898 = vst [vmem:[%s2808_s14 + $0xc8] sm:$0xff] %v1846_v19 }
 0x26a   : > { %v2452_v20 = vpop.f32.mrb[12].mxu0  ;;  %v2468_v25 = vpop.f32.mrb[12].mxu1 }
 0x26b   : > { %v1803_v26 = vadd.f32 %v2452_v20, %v3002_v47  ;;  %v1867_v27 = vadd.f32 %v2468_v25, %v3002_v47  ;;  %v1794_v28 = vpop.f32.mrb[13].mxu0  ;;  %v1858_v21 = vpop.f32.mrb[13].mxu1 }
 0x26c   : > { %v1795_v29 = vadd.f32 %v3002_v47, %v1794_v28  ;;  %v1859_v30 = vadd.f32 %v3002_v47, %v1858_v21  ;;  %v2453_v22 = vpop.f32.mrb[14].mxu0  ;;  %v2469_v31 = vpop.f32.mrb[14].mxu1 }
 0x26d   : > { %1887 = vst [vmem:[%s2808_s14 + $0x70] sm:$0xff] %v1803_v26  ;;  %1903 = vst [vmem:[%s2808_s14 + $0xf0] sm:$0xff] %v1867_v27  ;;  %v1806_v32 = vadd.f32 %v2453_v22, %v3002_v47  ;;  %v1870_v33 = vadd.f32 %v2469_v31, %v3002_v47  ;;  %v1797_v34 = vpop.f32.mrb[15].mxu0  ;;  %v1861_v23 = vpop.f32.mrb[15].mxu1 }
 0x26e   : > { %1885 = vst [vmem:[%s2808_s14 + $0x60] sm:$0xff] %v1795_v29  ;;  %1901 = vst [vmem:[%s2808_s14 + $0xe0] sm:$0xff] %v1859_v30  ;;  %v1798_v35 = vadd.f32 %v3002_v47, %v1797_v34  ;;  %v1862_v36 = vadd.f32 %v3002_v47, %v1861_v23 }
 0x26f   : > { %1888 = vst [vmem:[%s2808_s14 + $0x78] sm:$0xff] %v1806_v32  ;;  %1904 = vst [vmem:[%s2808_s14 + $0xf8] sm:$0xff] %v1870_v33 }
 0x270   : > { %1886 = vst [vmem:[%s2808_s14 + $0x68] sm:$0xff] %v1798_v35  ;;  %1902 = vst [vmem:[%s2808_s14 + $0xe8] sm:$0xff] %v1862_v36 }
 0x271 PF: > { %s15_s22 = sadd.s32 1, %s2727_s22   ;;  %s3089_s18 = smov %s2719_s20 }
 0x272   : > { %p12_p10 = scmp.ge.s32.totalorder %s15_s22, 8   ;;  %s3090_s19 = smov %s2723_s21 }
 0x273   : > { %s3091_s20 = smov %s3094_s23  ;;  %s3092_s21 = smov %s3098_s24 }
 0x274   :  { %14 = sbr.rel (!%p12_p10) target bundleno = 3 (0x3), region = 85 }

// kernel: _lambda_.3
= control target key start
LH: loop header
LB: loop body
LE: loop exit
PB: predicated region body
PF: predicated region fallthrough
CT: control target
= control target key end

     0   :  { %10 = vsyncpa [#allocation3], 0  ;;  %s925_s0 = inlined_call_operand.vmem [shape: f32[4,768], index: 0, kind: input, shape index: {}]   ;;  %s926_s1 = inlined_call_operand.vmem [shape: f32[2,4,768], index: 1, kind: input, shape index: {}]   ;;  %s927_s2 = inlined_call_operand.vmem [shape: f32[2,1,768], index: 2, kind: input, shape index: {}]   ;;  %s928_s3 = inlined_call_operand.hbm [shape: f32[2,4,768], index: 3, kind: output, shape index: {0}]   ;;  %s929_s4 = inlined_call_operand.vmem [shape: f32[2,1,768], index: 4, kind: output, shape index: {1}]  }
   0x1   :  { %12 = vsyncpa [#allocation3 + $0x1], 0  ;;  %s786_s15 = smov 0   ;;  %s788_s16 = smov 0  }
   0x2   :  { %s790_s17 = smov 0   ;;  %s792_s18 = smov 0  }
   0x3   :  { %s794_s19 = smov 0   ;;  %s796_s20 = smov 0  }
   0x4 LB: > { %s591_s21 = sadd.s32 4294967295, %s758_s20   ;;  %s592_s22 = sadd.s32 4294967294, %s758_s20   ;;  %s758_s20 = sphi %s796_s20, %s18_s20   ;;  %s754_s19 = sphi %s794_s19, %s936_s19   ;;  %s750_s18 = sphi %s792_s18, %s935_s18   ;;  %s746_s17 = sphi %s790_s17, %s934_s17   ;;  %s742_s16 = sphi %s788_s16, %s933_s16   ;;  %s738_s15 = sphi %s786_s15, %s932_s15  }
   0x5   : > { %s30_s23 = sadd.s32 1, %s754_s19  ;;  %s121_s24 = sadd.s32 1, %s746_s17 }
   0x6   : > { %p32_p0 = scmp.ge.s32.totalorder %s30_s23, 2  ;;  %p131_p1 = scmp.ne.s32.totalorder %s746_s17, %s742_s16 }
   0x7   : > { %p132_p2 = scmp.eq.s32.totalorder %s591_s21, 1  ;;  %p137_p3 = scmp.ne.s32.totalorder %s742_s16, %s738_s15 }
   0x8   : > { %s938_s23 = smov (%p32_p0, %s30_s23), 0  ;;  %p138_p5 = scmp.eq.s32.totalorder %s592_s22, 1 }
   0x9   : > { %p826_p4 = por %p132_p2, %p131_p1  ;;  %s116_s26 = ssub.s32 %s754_s19, %s938_s23 }
   0xa   : > { %p596_p6 = scmp.ge.s32.totalorder %s758_s20, 1  ;;  %p119_p7 = scmp.eq.s32.totalorder %s116_s26, 0 }
   0xb   : > { %p833_p8 = por %p138_p5, %p137_p3  ;;  %p218_p9 = scmp.lt.s32.totalorder %s758_s20, 3 }
   0xc   : > { %s839_s28 = scalar_select %p119_p7, %s746_s17, %s121_s24  }
   0xd   : > { %p219_p10 = pnand %p596_p6, %p218_p9 }
   0xe   : > { %p276_p11 = scmp.lt.s32.totalorder (!%p219_p10), %s750_s18, 1  ;;  %v304_v0 = vld [vmem:[%s925_s0] sm:$0xff] (!%p219_p10)  ;;  %v305_v1 = vld [vmem:[%s925_s0 + $0x8] sm:$0xff] (!%p219_p10)  ;;  %v306_v3 = vld [vmem:[%s925_s0 + $0x10] sm:$0xff] (!%p219_p10)  ;;  %s256_s26 = sand.u32 (!%p219_p10), 1, %s742_s16   ;;  %v419_v59 = vlaneseq (!%p219_p10) }
   0xf   : > { %222 = sbr.rel (%p219_p10) target bundleno = 74 (0x4a), region = 32  ;;  %v313_v2 = vrot.slane (!%p219_p10), %v304_v0, 6  ;;  %v314_v4 = vrot.slane (!%p219_p10), %v305_v1, 6  ;;  %v315_v5 = vrot.slane (!%p219_p10), %v306_v3, 6 }
  0x10   : > { %s611_s29 = smul.u32 (!%p219_p10), 24, %s256_s26  ;;  %vm421_vm0 = vcmp.lt.s32.totalorder (!%p219_p10), %v419_v59, 768 }
  0x11   : > { %v319_v7 = vsub.f32 (!%p219_p10), %v304_v0, %v313_v2  ;;  %v320_v10 = vsub.f32 (!%p219_p10), %v305_v1, %v314_v4  ;;  %v321_v16 = vsub.f32 (!%p219_p10), %v306_v3, %v315_v5  ;;  %s614_s5 = smul.u32 (!%p219_p10), 384, %s750_s18 }
  0x12   : > { %s258_s30 = scalar_lea.vmem (!%p219_p10), [#allocation2], %s611_s29 }
  0x13   : > { %v322_v17 = vadd.f32 (!%p219_p10), 1.0, %v319_v7  ;;  %v323_v20 = vadd.f32 (!%p219_p10), 1.0, %v320_v10  ;;  %v324_v22 = vadd.f32 (!%p219_p10), 1.0, %v321_v16  ;;  %s876_s13 = scalar_lea.hbm (!%p219_p10), %s928_s3, %s614_s5 }
  0x15   : > { %v325_v23 = vmul.f32 (!%p219_p10), 0.5, %v322_v17  ;;  %v326_v24 = vmul.f32 (!%p219_p10), 0.5, %v323_v20  ;;  %v327_v25 = vmul.f32 (!%p219_p10), 0.5, %v324_v22  ;;  %v601_v27 = vrot.slane (!%p219_p10), %v322_v17, 10 }
  0x16   : > { %s849_s7 = scalar_select %p276_p11, %s750_s18, 1  ;;  %v602_v29 = vrot.slane %v323_v20, 10  ;;  %v603_v32 = vrot.slane %v324_v22, 10 }
  0x17   : > { %v598_v26 = vrot.slane %v325_v23, 10  ;;  %v599_v28 = vrot.slane %v326_v24, 10  ;;  %v600_v31 = vrot.slane %v327_v25, 10 }
  0x18   : > { %s612_s10 = smul.u32 24, %s849_s7 }
  0x19   : > { %s613_s11 = smul.u32 6, %s849_s7  ;;  %v340_v34 = vadd.f32 %v598_v26, %v304_v0  ;;  %v341_v38 = vadd.f32 %v599_v28, %v305_v1  ;;  %v342_v45 = vadd.f32 %v600_v31, %v306_v3  ;;  %s425_s7 = scalar_lea.sflag [#allocation3], %s256_s26 }
  0x1a   : > { %s283_s14 = scalar_lea.vmem %s926_s1, %s612_s10  ;;  %s449_s10 = sshll.u32 %s258_s30, 4  ;;  %s878_s10 = int_to_ptr.vmem [resolvable:$true] %s449_s10 }
  0x1b   : > { %v307_v6 = vld [vmem:[%s283_s14] sm:$0xff]  ;;  %v308_v8 = vld [vmem:[%s283_s14 + $0x8] sm:$0xff]  ;;  %s292_s24 = scalar_lea.vmem %s927_s2, %s613_s11  ;;  %v309_v12 = vld [vmem:[%s283_s14 + $0x10] sm:$0xff]  ;;  %s302_s9 = scalar_lea.vmem %s929_s4, %s613_s11 }
  0x1c   : > { %v361_v9 = vmin.f32 %v307_v6, 4.1351666  ;;  %v362_v11 = vmin.f32 %v308_v8, 4.1351666  ;;  %v412_v13 = vld [vmem:[%s292_s24] sm:$0x3f]  ;;  %v355_v35 = vmul.f32 %v601_v27, %v307_v6  ;;  %v356_v39 = vmul.f32 %v602_v29, %v308_v8 }
  0x1d   : > { %v363_v18 = vmin.f32 %v309_v12, 4.1351666  ;;  %v607_v19 = vmul.f32 -1.442695, %v412_v13  ;;  %v357_v46 = vmul.f32 %v603_v32, %v309_v12  ;;  %s680_s11 = scalar_lea.vmem %s878_s10, 384  ;;  %s760_s14 = smov [#allocation2]  }
  0x1e   : > { %v364_v14 = vmul.f32 1.442695, %v361_v9  ;;  %v366_v15 = vmul.f32 1.442695, %v362_v11  ;;  %v358_v48 = vadd.f32 %v355_v35, %v340_v34  ;;  %v359_v50 = vadd.f32 %v356_v39, %v341_v38  ;;  %p681_p12 = scmp.ne.s32.totalorder %s878_s10, %s680_s11  ;;  %s684_s21 = sshll.u32 %s760_s14, 4  ;;  %s685_s21 = int_to_ptr.vmem [resolvable:$false] %s684_s21 }
  0x1f   : > { %v368_v21 = vmul.f32 1.442695, %v363_v18  ;;  %v360_v55 = vadd.f32 %v357_v46, %v342_v45  ;;  %s686_s22 = scalar_lea.vmem %s685_s21, 768  ;;  %p687_p1 = scmp.lt.s32.totalorder %s878_s10, %s685_s21 }
  0x20   : > { %670 = vpow2.f32 %v364_v14  ;;  %p682_p13 = pnand %p681_p12, %p826_p4  ;;  %p688_p2 = scmp.lt.s32.totalorder %s686_s22, %s680_s11 }
  0x21   : > { %672 = vpow2.f32 %v366_v15 }
  0x22   : > { %674 = vpow2.f32 %v607_v19  ;;  %p683_p0 = pneg %p682_p13  ;;  %p689_p3 = por %p688_p2, %p687_p1 }
  0x23   : > { %676 = vpow2.f32 %v368_v21 }
  0x24   : > { %p690_p5 = pnand %p689_p3, %p683_p0 }
  0x2a   : > { %v671_v30 = vpop.eup %670 }
  0x2b   : > { %v673_v33 = vpop.eup %672  ;;  %v370_v36 = vmul.f32 %v671_v30, %v322_v17 }
  0x2c   : > { %v675_v37 = vpop.eup %674  ;;  %v371_v40 = vmul.f32 %v673_v33, %v323_v20 }
  0x2d   : > { %v677_v41 = vpop.eup %676  ;;  %v373_v42 = vmul.f32 0.5, %v370_v36  ;;  %v416_v43 = vadd.f32 1.0, %v675_v37 }
  0x2e   : > { %v374_v44 = vmul.f32 0.5, %v371_v40  ;;  %v372_v47 = vmul.f32 %v677_v41, %v324_v22 }
  0x2f   : > { %v379_v49 = vrot.slane %v373_v42, 6  ;;  %678 = vrcp.f32 %v416_v43 }
  0x30   : > { %v381_v51 = vrot.slane %v374_v44, 6  ;;  %v375_v52 = vmul.f32 0.5, %v372_v47 }
  0x31   : > { %v380_v53 = vrot.slane %v379_v49, 4 }
  0x32   : > { %v382_v54 = vrot.slane %v381_v51, 4  ;;  %v383_v56 = vrot.slane %v375_v52, 6 }
  0x33   : > { %v388_v57 = vsub.f32 %v358_v48, %v380_v53  ;;  %v394_v58 = vadd.f32 %v380_v53, %v358_v48 }
  0x34   : > { %v389_v60 = vsub.f32 %v359_v50, %v382_v54  ;;  %v384_v61 = vrot.slane %v383_v56, 4  ;;  %v395_v62 = vadd.f32 %v382_v54, %v359_v50 }
  0x35   : > { %391 = vst [vmem:[%s258_s30] sm:$0x33] %v388_v57  ;;  %v604_v63 = vadd.f32 -1.0, %v394_v58 }
  0x36   : > { %392 = vst [vmem:[%s258_s30 + $0x8] sm:$0x33] %v389_v60  ;;  %v390_v0 = vsub.f32 %v360_v55, %v384_v61  ;;  %v605_v1 = vadd.f32 -1.0, %v395_v62  ;;  %v396_v2 = vadd.f32 %v384_v61, %v360_v55 }
  0x37   : > { %v403_v3 = vrot.slane %v604_v63, 6 }
  0x38   : > { %393 = vst [vmem:[%s258_s30 + $0x10] sm:$0x33] %v390_v0  ;;  %v404_v4 = vrot.slane %v605_v1, 6  ;;  %v606_v5 = vadd.f32 -1.0, %v396_v2 }
  0x39   : > { %v679_v6 = vpop.eup %678  ;;  %409 = vst [vmem:[%s258_s30] sm:$0xcc] %v403_v3 }
  0x3a   : > { %410 = vst [vmem:[%s258_s30 + $0x8] sm:$0xcc] %v404_v4  ;;  %v405_v7 = vrot.slane %v606_v5, 6  ;;  %423 = vst.msk [vmem:[%s302_s9] sm:$0x3f] %vm421_vm0, %v679_v6 }
  0x3c   : > { %411 = vst [vmem:[%s258_s30 + $0x10] sm:$0xcc] %v405_v7 }
  0x3d   : > { %693 = shalt.err (!%p690_p5)
}
  0x3e   : > { %s694_s24 = scalar_lea.hbm %s876_s13, 384  ;;  %s698_s30 = scalar_lea.hbm %s928_s3, 768 }
  0x3f   : > { %p695_p6 = scmp.ne.s32.totalorder %s876_s13, %s694_s24  ;;  %p699_p10 = scmp.lt.u32.totalorder %s876_s13, %s928_s3 }
  0x40   : > { %p700_p11 = scmp.lt.u32.totalorder %s698_s30, %s694_s24  ;;  %p702_p13 = scmp.lt.u32.totalorder %s694_s24, %s876_s13 }
  0x41   : > { %p696_p7 = pnand %p695_p6, %p826_p4 }
  0x42   : > { %p701_p12 = por %p700_p11, %p699_p10 }
  0x43   : > { %p697_p9 = pneg %p696_p7 }
  0x44   : > { %p703_p0 = por %p702_p13, %p701_p12 }
  0x46   : > { %p704_p1 = pnand %p703_p0, %p697_p9 }
  0x48   : > { %707 = shalt.err (!%p704_p1)
}
  0x49   : > { %615 = dma.vmem_to_hbm [thread:$0]  (%p826_p4), %s878_s10, 384, %s876_s13, %s425_s7  }
  0x4a PF: > { %p621_p2 = scmp.ge.s32.totalorder %s758_s20, 2  ;;  %s465_s8 = sand.u32 1, %s738_s15  }
  0x4b   : > { %s466_s9 = scalar_lea.sflag [#allocation3], %s465_s8 }
  0x4c   : > { %p618_p3 = pnand %p621_p2, %p833_p8 }
  0x4e   : > { %733 = dma.done.wait (!%p618_p3), %s466_s9, 384  }
  0x4f   : > { %735 = vsyncadd (!%p618_p3), %s466_s9, 4294966912  ;;  %s18_s20 = sadd.s32 1, %s758_s20   ;;  %s932_s15 = smov %s742_s16 }
  0x50   : > { %p15_p5 = scmp.ge.s32.totalorder %s18_s20, 4   ;;  %s933_s16 = smov %s746_s17 }
  0x51   : > { %s934_s17 = smov %s839_s28  ;;  %s935_s18 = smov %s754_s19 }
  0x52   : > { %s936_s19 = smov %s938_s23  ;;  %17 = sbr.rel (!%p15_p5) target bundleno = 4 (0x4), region = 85 }
  0x59   :  { %482 = vsyncpa [#allocation3], 1 }
  0x5a   :  { %484 = vsyncpa [#allocation3 + $0x1], 1 }

</bundles_post_ra>
